<compile_context>
chip_gen: v7x
topology: tpu7x:2x2x1
jax: 0.10.0
libtpu: 0.0.40
codegen_flags: <defaults>
</compile_context>

<pallas_src>
import jax
import jax.numpy as jnp
from jax.experimental import pallas as pl
from jax.experimental.pallas import tpu as pltpu


_SMALL_C_MAX = 8  # up to this many classes, 2nd projection runs on VPU + XLU


def _round_up(v, m):
    return ((v + m - 1) // m) * m


def _attn_kernel_small_c(x_ref, w1_ref, b1_ref, w2_ref, b2_ref, a_ref):
    # x_ref : (TN, L)  input row tile (f32 or bf16) -> cast to bf16 in-kernel
    # w1_ref: (L, D)   bf16 first-layer weight (pre-transposed)
    # b1_ref: (1, D)   f32
    # w2_ref: (C, D)   f32 second-layer weight rows (small C)
    # b2_ref: (1, C)   f32
    # a_ref : (TN, C)  f32 attention logits for this row tile
    x_bf = x_ref[...].astype(jnp.bfloat16)
    h = jnp.dot(x_bf, w1_ref[...], preferred_element_type=jnp.float32)
    h = jnp.tanh(h + b1_ref[...])                       # f32 VPU/EUP epilogue
    C = a_ref.shape[-1]
    # Per-class VPU multiply + XLU lane reduce: keeps the MXU free for the
    # next tile's big (TN, L) x (L, D) matmul.  Loop is unrolled at trace time.
    cols = [jnp.sum(h * w2_ref[c:c + 1, :], axis=-1, keepdims=True)
            for c in range(C)]
    a = (cols[0] if C == 1 else jnp.concatenate(cols, axis=-1)) + b2_ref[...]
    a_ref[...] = a.astype(a_ref.dtype)


def _attn_kernel_mxu_c(x_ref, w1_ref, b1_ref, w2_ref, b2_ref, a_ref):
    # Larger n_classes: second projection also on the MXU (bf16, f32 accum).
    x_bf = x_ref[...].astype(jnp.bfloat16)
    h = jnp.dot(x_bf, w1_ref[...], preferred_element_type=jnp.float32)
    h = jnp.tanh(h + b1_ref[...])
    a = jnp.dot(h.astype(jnp.bfloat16), w2_ref[...],
                preferred_element_type=jnp.float32) + b2_ref[...]
    a_ref[...] = a.astype(a_ref.dtype)


def attn_net_forward(x, w1_t, b1, w2_t, b2, *, tile_n=1024):
    """CLAM Attn_Net.forward (inference): returns (A, x).

    x    : (N, L) float32 (or bfloat16; bf16 input halves HBM read traffic and
           keeps v5e MXU-bound — recommended when the producer can emit bf16)
    w1_t : (L, D)  first-layer weight, pre-transposed (W1^T)
    b1   : (D,)
    w2_t : (D, C)  second-layer weight, pre-transposed (W2^T)
    b2   : (C,)
    """
    N, L = x.shape
    D = w1_t.shape[1]
    C = w2_t.shape[1]
    assert tile_n % 128 == 0, "tile_n must be a multiple of 128"

    # Row-tile selection:
    #  * never over-pad small bags (round N up to 128 only),
    #  * force >= 2 grid steps when possible so the 'parallel' axis can shard
    #    across v7x's two TensorCores (no effect on v5e/v6e).
    tile_n = max(128, min(tile_n, _round_up(N, 128)))
    if N > 128 and pl.cdiv(N, tile_n) < 2:
        tile_n = max(128, _round_up(pl.cdiv(N, 2), 128))
    n_tiles = pl.cdiv(N, tile_n)

    w1_bf = w1_t.astype(jnp.bfloat16)                    # small: ~L*D*2 bytes
    b1_2d = b1.reshape(1, D).astype(jnp.float32)
    b2_2d = b2.reshape(1, C).astype(jnp.float32)

    if C <= _SMALL_C_MAX:
        kernel = _attn_kernel_small_c
        w2_op = jnp.transpose(w2_t).astype(jnp.float32)   # (C, D) rows, f32
        w2_spec = pl.BlockSpec((C, D), lambda i: (0, 0))
    else:
        kernel = _attn_kernel_mxu_c
        w2_op = w2_t.astype(jnp.bfloat16)                 # (D, C) bf16
        w2_spec = pl.BlockSpec((D, C), lambda i: (0, 0))
    b2_spec = pl.BlockSpec((1, C), lambda i: (0, 0))

    # Scoped VMEM sized from the actual working set (double-buffered x tile,
    # resident bf16 W1^T, output tile, f32 h intermediate) with 1.5x headroom,
    # capped at 56 MiB to stay under v7x's 64 MiB physical VMEM.
    x_bytes = jnp.dtype(x.dtype).itemsize
    working = (2 * tile_n * L * x_bytes          # x tile, double-buffered
               + 2 * L * D * 2                   # W1^T (bf16)
               + 2 * tile_n * C * 4              # output tile
               + 4 * tile_n * D * 4)             # h / epilogue scratch headroom
    vmem_limit = int(min(56 * 1024 * 1024,
                         max(32 * 1024 * 1024, int(working * 1.5))))

    a = pl.pallas_call(
        kernel,
        out_shape=jax.ShapeDtypeStruct((N, C), jnp.float32),
        grid_spec=pltpu.PrefetchScalarGridSpec(
            num_scalar_prefetch=0,
            grid=(n_tiles,),
            in_specs=[
                pl.BlockSpec((tile_n, L), lambda i: (i, 0)),   # x row tile
                pl.BlockSpec((L, D), lambda i: (0, 0)),        # W1^T (resident)
                pl.BlockSpec((1, D), lambda i: (0, 0)),        # b1
                w2_spec,                                       # W2
                b2_spec,                                       # b2
            ],
            out_specs=pl.BlockSpec((tile_n, C), lambda i: (i, 0)),
        ),
        compiler_params=pltpu.CompilerParams(
            dimension_semantics=("parallel",),
            vmem_limit_bytes=vmem_limit,
        ),
    )(x, w1_bf, b1_2d, w2_op, b2_2d)

    return a, x


def init_attn_net_params(key, L, D, n_classes):
    """Deterministic init mimicking nn.Linear default (uniform +/- 1/sqrt(fan_in))."""
    k1, k2, k3, k4 = jax.random.split(key, 4)
    bound1 = 1.0 / jnp.sqrt(L)
    bound2 = 1.0 / jnp.sqrt(D)
    # stored already transposed: W1^T (L, D), W2^T (D, C)
    w1_t = jax.random.uniform(k1, (L, D), jnp.float32, -bound1, bound1)
    b1 = jax.random.uniform(k2, (D,), jnp.float32, -bound1, bound1)
    w2_t = jax.random.uniform(k3, (D, n_classes), jnp.float32, -bound2, bound2)
    b2 = jax.random.uniform(k4, (n_classes,), jnp.float32, -bound2, bound2)
    return w1_t, b1, w2_t, b2


if __name__ == "__main__":
    # Module defaults: L=1024, D=256, n_classes=1.  N (bag size) deliberately
    # NOT a multiple of the tile to exercise the unpadded partial-block path.
    N, L, D, n_classes = 333, 1024, 256, 1

    key = jax.random.PRNGKey(0)
    kx, kp = jax.random.split(key)
    x = jax.random.normal(kx, (N, L), jnp.float32)
    w1_t, b1, w2_t, b2 = init_attn_net_params(kp, L, D, n_classes)

    a, x_out = attn_net_forward(x, w1_t, b1, w2_t, b2)
    jax.block_until_ready((a, x_out))

    # Reference with the same bf16 operand rounding (f32 accumulation).
    h_bf_ref = jnp.tanh(
        jnp.dot(x.astype(jnp.bfloat16), w1_t.astype(jnp.bfloat16),
                preferred_element_type=jnp.float32) + b1)
    a_bf_ref = h_bf_ref @ w2_t + b2
    # Full-f32 reference (loose tolerance: bf16 matmul operands).
    a_f32_ref = jnp.tanh(x @ w1_t + b1) @ w2_t + b2

    assert a.shape == (N, n_classes)
    assert x_out.shape == (N, L)
    assert jnp.allclose(a, a_bf_ref, atol=2e-3, rtol=2e-3), float(
        jnp.max(jnp.abs(a - a_bf_ref)))
    assert jnp.allclose(a, a_f32_ref, atol=5e-2, rtol=5e-2), float(
        jnp.max(jnp.abs(a - a_f32_ref)))
    assert jnp.array_equal(x_out, x)

    # Exercise the small-C>1 VPU/XLU path (n_classes=3) on the same x.
    w1b, b1b, w2b, b2b = init_attn_net_params(jax.random.PRNGKey(1), L, D, 3)
    a3, _ = attn_net_forward(x, w1b, b1b, w2b, b2b)
    jax.block_until_ready(a3)
    a3_ref = jnp.tanh(x @ w1b + b1b) @ w2b + b2b
    assert a3.shape == (N, 3)
    assert jnp.allclose(a3, a3_ref, atol=5e-2, rtol=5e-2), float(
        jnp.max(jnp.abs(a3 - a3_ref)))

    print("KERNEL_OK")
</pallas_src>

<mosaic_0001>
module attributes {stable_mosaic.version = 11 : i64} {
  func.func @_attn_kernel_small_c(%arg0: i32, %arg1: memref<256x1024xf32, #tpu.memory_space<vmem>>, %arg2: memref<1024x256xbf16, #tpu.memory_space<vmem>>, %arg3: memref<1x256xf32, #tpu.memory_space<vmem>>, %arg4: memref<1x256xf32, #tpu.memory_space<vmem>>, %arg5: memref<1x1xf32, #tpu.memory_space<vmem>>, %arg6: memref<256x1xf32, #tpu.memory_space<vmem>>) attributes {dimension_semantics = [#tpu.dimension_semantics<parallel>], iteration_bounds = array<i64: 2>, scalar_prefetch = 0 : i64, scratch_operands = 0 : i64, tpu.core_type = #tpu.core_type<tc>, window_params = [{transform_indices = @transform_0, window_bounds = array<i64: 256, 1024>}, {pipeline_mode = #tpu.pipeline_mode<synchronous>, transform_indices = @transform_1, window_bounds = array<i64: 1024, 256>}, {pipeline_mode = #tpu.pipeline_mode<synchronous>, transform_indices = @transform_2, window_bounds = array<i64: 1, 256>}, {pipeline_mode = #tpu.pipeline_mode<synchronous>, transform_indices = @transform_3, window_bounds = array<i64: 1, 256>}, {pipeline_mode = #tpu.pipeline_mode<synchronous>, transform_indices = @transform_4, window_bounds = array<i64: 1, 1>}, {transform_indices = @transform_5, window_bounds = array<i64: 256, 1>}]} {
    %c0 = arith.constant 0 : index
    %c0_0 = arith.constant 0 : index
    %0 = vector.load %arg1[%c0, %c0_0] : memref<256x1024xf32, #tpu.memory_space<vmem>>, vector<256x1024xf32>
    %1 = arith.truncf %0 : vector<256x1024xf32> to vector<256x1024xbf16>
    %c0_1 = arith.constant 0 : index
    %c0_2 = arith.constant 0 : index
    %2 = vector.load %arg2[%c0_1, %c0_2] : memref<1024x256xbf16, #tpu.memory_space<vmem>>, vector<1024x256xbf16>
    %cst = arith.constant dense<0.000000e+00> : vector<256x256xf32>
    %3 = tpu.matmul %1, %2, %cst {dimension_numbers = #tpu.dot_dimension_numbers<[1], [0], [0], [1], [0, 0, 1, 1], [], []>} : vector<256x1024xbf16>, vector<1024x256xbf16>, vector<256x256xf32> -> vector<256x256xf32>
    %c0_3 = arith.constant 0 : index
    %c0_4 = arith.constant 0 : index
    %4 = vector.load %arg3[%c0_3, %c0_4] : memref<1x256xf32, #tpu.memory_space<vmem>>, vector<1x256xf32>
    %5 = vector.broadcast %4 : vector<1x256xf32> to vector<256x256xf32>
    %6 = arith.addf %3, %5 : vector<256x256xf32>
    %7 = math.tanh %6 : vector<256x256xf32>
    %c0_5 = arith.constant 0 : index
    %c0_6 = arith.constant 0 : index
    %8 = vector.load %arg4[%c0_5, %c0_6] : memref<1x256xf32, #tpu.memory_space<vmem>>, vector<1x256xf32>
    %9 = vector.broadcast %8 : vector<1x256xf32> to vector<256x256xf32>
    %10 = arith.mulf %7, %9 : vector<256x256xf32>
    %cst_7 = arith.constant dense<0.000000e+00> : vector<256xf32>
    %11 = vector.multi_reduction <add>, %10, %cst_7 [1] : vector<256x256xf32> to vector<256xf32>
    %12 = vector.shape_cast %11 : vector<256xf32> to vector<256x1xf32>
    %c0_8 = arith.constant 0 : index
    %c0_9 = arith.constant 0 : index
    %13 = vector.load %arg5[%c0_8, %c0_9] : memref<1x1xf32, #tpu.memory_space<vmem>>, vector<1x1xf32>
    %14 = vector.broadcast %13 : vector<1x1xf32> to vector<256x1xf32>
    %15 = arith.addf %12, %14 : vector<256x1xf32>
    %c0_10 = arith.constant 0 : index
    %c0_11 = arith.constant 0 : index
    %16 = vector.load %arg6[%c0_10, %c0_11] : memref<256x1xf32, #tpu.memory_space<vmem>>, vector<256x1xf32>
    tpu.vector_store %arg6[%c0_10, %c0_11], %15 {strides = array<i32>} : memref<256x1xf32, #tpu.memory_space<vmem>>, vector<256x1xf32>,
    return
  }
  func.func @transform_0(%arg0: i32) -> (i32, i32) {
    %c0_i32 = arith.constant 0 : i32
    %c0_i32_0 = arith.constant 0 : i32
    return %arg0, %c0_i32 : i32, i32
  }
  func.func @transform_1(%arg0: i32) -> (i32, i32) {
    %c0_i32 = arith.constant 0 : i32
    %c0_i32_0 = arith.constant 0 : i32
    %c0_i32_1 = arith.constant 0 : i32
    return %c0_i32, %c0_i32_0 : i32, i32
  }
  func.func @transform_2(%arg0: i32) -> (i32, i32) {
    %c0_i32 = arith.constant 0 : i32
    %c0_i32_0 = arith.constant 0 : i32
    %c0_i32_1 = arith.constant 0 : i32
    return %c0_i32, %c0_i32_0 : i32, i32
  }
  func.func @transform_3(%arg0: i32) -> (i32, i32) {
    %c0_i32 = arith.constant 0 : i32
    %c0_i32_0 = arith.constant 0 : i32
    %c0_i32_1 = arith.constant 0 : i32
    return %c0_i32, %c0_i32_0 : i32, i32
  }
  func.func @transform_4(%arg0: i32) -> (i32, i32) {
    %c0_i32 = arith.constant 0 : i32
    %c0_i32_0 = arith.constant 0 : i32
    %c0_i32_1 = arith.constant 0 : i32
    return %c0_i32, %c0_i32_0 : i32, i32
  }
  func.func @transform_5(%arg0: i32) -> (i32, i32) {
    %c0_i32 = arith.constant 0 : i32
    %c0_i32_0 = arith.constant 0 : i32
    return %arg0, %c0_i32 : i32, i32
  }
}

</mosaic_0001>

<bundles_post_ra>
// kernel: tpu_custom_call.1
= control target key start
LH: loop header
LB: loop body
LE: loop exit
PB: predicated region body
PF: predicated region fallthrough
CT: control target
= control target key end

     0   :  { %s4907_s0 = inlined_call_operand.hbm [shape: f32[333,1024], index: 0, kind: input, shape index: {}]   ;;  %s4908_s1 = inlined_call_operand.hbm [shape: bf16[1024,256], index: 1, kind: input, shape index: {}]   ;;  %s4909_s2 = inlined_call_operand.hbm [shape: f32[1,256], index: 2, kind: input, shape index: {}]   ;;  %s4910_s3 = inlined_call_operand.hbm [shape: f32[1,256], index: 3, kind: input, shape index: {}]   ;;  %s4911_s4 = inlined_call_operand.<no memory space> [shape: f32[1,1], index: 4, kind: input, shape index: {}]   ;;  %s4912_s5 = inlined_call_operand.vmem [shape: f32[333,1], index: 5, kind: output, shape index: {}]  }
   0x1   :  { %v10_v0 = vstv %s4911_s4 }
   0x2   :  { %11 = vst [vmem:[#allocation2] sm:$0x1] %v10_v0 }
   0x3   :  { %12 = vsyncpa [#allocation4], 0 }
   0x4   :  { %14 = vsyncpa [#allocation4 + $0x1], 0 }
   0x5   :  { %15 = vsyncpa [#allocation6], 0 }
   0x6   :  { %16 = vsyncpa [#allocation9], 0  ;;  %s4065_s20 = smov 0   ;;  %s4067_s21 = smov 0  }
   0x7   :  { %s4069_s22 = smov 0   ;;  %s4071_s23 = smov 0  }
   0x8 LB: > { %s4084_s4 = sadd.s32 4294967295, %s3990_s23   ;;  %s4087_s24 = sadd.s32 1, %s3990_s23   ;;  %s3990_s23 = sphi %s4071_s23, %s4938_s23   ;;  %s3986_s22 = sphi %s4069_s22, %s4937_s22   ;;  %s3982_s21 = sphi %s4067_s21, %s4936_s21   ;;  %s3978_s20 = sphi %s4065_s20, %s4935_s20  }
   0x9   : > { %s26_s25 = ssub.s32 %s3990_s23, %s4087_s24  ;;  %s29_s26 = sadd.s32 1, %s3986_s22 }
   0xa   : > { %p27_p0 = scmp.eq.s32.totalorder %s26_s25, 0  ;;  %p36_p1 = scmp.ne.s32.totalorder %s3986_s22, %s3982_s21 }
   0xb   : > { %p37_p2 = scmp.eq.s32.totalorder %s3990_s23, 0  ;;  %p42_p3 = scmp.ne.s32.totalorder %s3982_s21, %s3978_s20 }
   0xc   : > { %s4097_s27 = scalar_select %p27_p0, %s3986_s22, %s29_s26  }
   0xd   : > { %p4099_p4 = por %p37_p2, %p36_p1  ;;  %p4913_p5 = scmp.eq.s32.totalorder %s4084_s4, 0 }
   0xe   : > { %p150_p6 = scmp.eq.s32.totalorder %s4084_s4, 1  ;;  %p2924_p7 = scmp.ge.s32.totalorder %s3990_s23, 1 }
   0xf   : > { %s4916_s28 = scalar_select %p4099_p4, 1, 0 }
  0x10   : > { %p4108_p8 = por %p4913_p5, %p42_p3  ;;  %p163_p9 = scmp.lt.s32.totalorder %s3990_s23, 3 }
  0x11   : > { %p4113_p10 = por %p150_p6, %p36_p1  ;;  %s4024_s7 = smov [#allocation5]  }
  0x12   : > { %s4917_s29 = scalar_select %p4108_p8, 1, 0 }
  0x13   : > { %s4918_s30 = scalar_select %p4113_p10, 1, 0 }
  0x14   : > { %p4117_p11 = pnand %p2924_p7, %p163_p9  ;;  %s175_s8 = sshll.u32 %s4024_s7, 4  ;;  %s4123_s8 = int_to_ptr.vmem [resolvable:$true] %s175_s8 }
  0x15   : > { %s4025_s10 = smov [#allocation7]   ;;  %s4026_s12 = smov [#allocation8]  }
  0x16   : > { %s4919_s6 = scalar_select %p4117_p11, 1, 0 }
  0x17   : > { %p3365_p12 = pneg %p4117_p11  ;;  %s189_s11 = sshll.u32 %s4025_s10, 4  ;;  %s4131_s11 = int_to_ptr.vmem [resolvable:$true] %s189_s11 }
  0x18   : > { %s4133_s13 = sshll.u32 %s4026_s12, 4  ;;  %s3804_s16 = scalar_lea.hbm %s4908_s1, 16384  ;;  %s201_s13 = int_to_ptr.vmem [resolvable:$true] %s4133_s13 }
  0x19   : > { %p4127_p13 = pnand %p3365_p12, %p4913_p5  ;;  %p3805_p0 = scmp.ne.s32.totalorder %s4908_s1, %s3804_s16 }
  0x1a   : > { %p3811_p6 = scmp.lt.u32.totalorder %s3804_s16, %s4908_s1 }
  0x1b   : > { %p4143_p1 = pneg %p4127_p13 }
  0x1d   : > { %p3807_p2 = pnand %p4143_p1, %p3805_p0 }
  0x1f   : > { %p3808_p3 = pneg %p3807_p2 }
  0x21   : > { %p3813_p7 = pnand %p3811_p6, %p3808_p3 }
  0x23   : > { %3816 = shalt.err (!%p3813_p7)
}
  0x24   : > { %s3817_s26 = scalar_lea.vmem %s4123_s8, 16384  ;;  %p3825_p10 = scmp.lt.s32.totalorder %s4123_s8, %s4123_s8 }
  0x25   : > { %p3818_p9 = scmp.ne.s32.totalorder %s4123_s8, %s3817_s26  ;;  %p3826_p8 = scmp.lt.s32.totalorder %s3817_s26, %s3817_s26 }
  0x27   : > { %p3820_p12 = pnand %p3818_p9, %p4143_p1  ;;  %p3827_p0 = por %p3826_p8, %p3825_p10 }
  0x29   : > { %p3821_p5 = pneg %p3820_p12 }
  0x2b   : > { %p3828_p2 = pnand %p3827_p0, %p3821_p5 }
  0x2d   : > { %3831 = shalt.err (!%p3828_p2)
}
  0x2e   : > { %s4027_s7 = smov 128   ;;  %s4028_s10 = smov 8  }
  0x2f   : > { %3368 = dma.hbm_to_vmem [thread:$0]  (!%p4127_p13), %s4908_s1, 16384, %s4123_s8, [#allocation6], %s4027_s7, %s4027_s7, %s4028_s10  }
  0x30   : > { %s3832_s17 = scalar_lea.hbm %s4909_s2, 32 }
  0x31   : > { %p3833_p8 = scmp.ne.s32.totalorder %s4909_s2, %s3832_s17  ;;  %p3839_p3 = scmp.lt.u32.totalorder %s3832_s17, %s4909_s2 }
  0x33   : > { %p3835_p5 = pnand %p3833_p8, %p4143_p1 }
  0x35   : > { %p3836_p10 = pneg %p3835_p5 }
  0x37   : > { %p3841_p6 = pnand %p3839_p3, %p3836_p10 }
  0x39   : > { %3844 = shalt.err (!%p3841_p6)
}
  0x3a   : > { %s3845_s8 = scalar_lea.vmem %s4131_s11, 32  ;;  %p3853_p0 = scmp.lt.s32.totalorder %s4131_s11, %s4131_s11 }
  0x3b   : > { %p3846_p7 = scmp.ne.s32.totalorder %s4131_s11, %s3845_s8  ;;  %p3854_p2 = scmp.lt.s32.totalorder %s3845_s8, %s3845_s8 }
  0x3d   : > { %p3848_p9 = pnand %p3846_p7, %p4143_p1  ;;  %p3855_p8 = por %p3854_p2, %p3853_p0 }
  0x3f   : > { %p3849_p12 = pneg %p3848_p9 }
  0x41   : > { %p3856_p5 = pnand %p3855_p8, %p3849_p12 }
  0x43   : > { %3859 = shalt.err (!%p3856_p5)
}
  0x44   : > { %3371 = dma.hbm_to_vmem [thread:$0]  (!%p4127_p13), %s4909_s2, 32, %s4131_s11, [#allocation6]  }
  0x45   : > { %s3860_s15 = scalar_lea.hbm %s4910_s3, 32 }
  0x46   : > { %p3861_p10 = scmp.ne.s32.totalorder %s4910_s3, %s3860_s15  ;;  %p3867_p7 = scmp.lt.u32.totalorder %s3860_s15, %s4910_s3 }
  0x48   : > { %p3863_p3 = pnand %p3861_p10, %p4143_p1 }
  0x4a   : > { %p3864_p6 = pneg %p3863_p3 }
  0x4c   : > { %p3869_p9 = pnand %p3867_p7, %p3864_p6 }
  0x4e   : > { %3872 = shalt.err (!%p3869_p9)
}
  0x4f   : > { %s3873_s25 = scalar_lea.vmem %s201_s13, 32  ;;  %p3881_p8 = scmp.lt.s32.totalorder %s201_s13, %s201_s13 }
  0x50   : > { %p3874_p12 = scmp.ne.s32.totalorder %s201_s13, %s3873_s25  ;;  %p3882_p5 = scmp.lt.s32.totalorder %s3873_s25, %s3873_s25 }
  0x52   : > { %p3876_p0 = pnand %p3874_p12, %p4143_p1  ;;  %p3883_p11 = por %p3882_p5, %p3881_p8 }
  0x54   : > { %p3877_p2 = pneg %p3876_p0 }
  0x56   : > { %p3884_p4 = pnand %p3883_p11, %p3877_p2 }
  0x58   : > { %3887 = shalt.err (!%p3884_p4)
}
  0x59   : > { %3374 = dma.hbm_to_vmem [thread:$0]  (!%p4127_p13), %s4910_s3, 32, %s201_s13, [#allocation9]  }
  0x5a   : > { %p2928_p10 = scmp.ge.s32.totalorder %s3990_s23, 2 }
  0x5b   : > { %p4922_p3 = scmp.ne.s32.totalorder (!%p2928_p10), %s4916_s28, 0 }
  0x5c   : > { %210 = sbr.rel (%p2928_p10) target bundleno = 134 (0x86), region = 32 }
  0x63   : > { %213 = sbr.rel (!%p4922_p3) target bundleno = 134 (0x86), region = 36  ;;  %s214_s19 = sand.u32 (%p4922_p3), 1, %s3986_s22  }
  0x64   : > { %s2930_s8 = sshll.u32 (%p4922_p3), %s3990_s23, 5  ;;  %s2929_s7 = sshll.u32 (%p4922_p3), %s214_s19, 11 }
  0x65   : > { %s220_s10 = ssub.s32 (%p4922_p3), 42, %s2930_s8  ;;  %s4214_s14 = scalar_lea.sflag (%p4922_p3), [#allocation4], %s214_s19 }
  0x66   : > { %p221_p11 = scmp.lt.s32.totalorder (%p4922_p3), %s220_s10, 32  ;;  %s218_s13 = scalar_lea.vmem (%p4922_p3), [#allocation3], %s2929_s7 }
  0x6a   : > { %s4940_s10 = smov (!%p221_p11, %s220_s10), 32 }
  0x6b   : > { %s4211_s12 = sshll.u32 %s4940_s10, 10 }
  0x6c   : > { %s226_s9 = ssub.s32 32768, %s4211_s12 }
  0x6d   : > { %227 = vsyncadd %s4214_s14, %s226_s9  ;;  %p2933_p4 = scmp.ne.s32.totalorder %s4211_s12, 0  ;;  %s3092_s28 = sshll.u32 %s3990_s23, 15 }
  0x6e   : > { %s4222_s17 = scalar_lea.hbm %s4907_s0, %s3092_s28  ;;  %s233_s18 = sshll.u32 %s218_s13, 4  ;;  %s4224_s18 = int_to_ptr.vmem [resolvable:$true] %s233_s18 }
  0x6f   : > { %s3888_s20 = scalar_lea.hbm %s4222_s17, %s4211_s12  ;;  %s3892_s23 = scalar_lea.hbm %s4907_s0, 43008 }
  0x70   : > { %p3889_p13 = scmp.ne.s32.totalorder %s4222_s17, %s3888_s20  ;;  %p3893_p7 = scmp.lt.u32.totalorder %s4222_s17, %s4907_s0 }
  0x71   : > { %p3894_p9 = scmp.lt.u32.totalorder %s3892_s23, %s3888_s20  ;;  %p3896_p0 = scmp.lt.u32.totalorder %s3888_s20, %s4222_s17 }
  0x72   : > { %p3890_p1 = pnand %p3889_p13, %p2933_p4 }
  0x73   : > { %p3895_p12 = por %p3894_p9, %p3893_p7 }
  0x74   : > { %p3891_p6 = pneg %p3890_p1 }
  0x75   : > { %p3897_p2 = por %p3896_p0, %p3895_p12 }
  0x77   : > { %p3898_p8 = pnand %p3897_p2, %p3891_p6 }
  0x79   : > { %3901 = shalt.err (!%p3898_p8)
}
  0x7a   : > { %s3902_s8 = scalar_lea.vmem %s4224_s18, %s4211_s12  ;;  %s4029_s7 = smov [#allocation3]  }
  0x7b   : > { %p3903_p5 = scmp.ne.s32.totalorder %s4224_s18, %s3902_s8  ;;  %s3906_s10 = sshll.u32 %s4029_s7, 4  ;;  %s3907_s10 = int_to_ptr.vmem [resolvable:$false] %s3906_s10 }
  0x7c   : > { %s3908_s9 = scalar_lea.vmem %s3907_s10, 65536  ;;  %p3909_p11 = scmp.lt.s32.totalorder %s4224_s18, %s3907_s10 }
  0x7d   : > { %p3904_p10 = pnand %p3903_p5, %p2933_p4  ;;  %p3910_p13 = scmp.lt.s32.totalorder %s3908_s9, %s3902_s8 }
  0x7f   : > { %p3905_p3 = pneg %p3904_p10  ;;  %p3911_p1 = por %p3910_p13, %p3909_p11 }
  0x81   : > { %p3912_p7 = pnand %p3911_p1, %p3905_p3 }
  0x83   : > { %3915 = shalt.err (!%p3912_p7)
}
  0x84   : > { %s4030_s13 = smov 1024   ;;  %s4031_s28 = smov 64  }
  0x85   : > { %239 = dma.hbm_to_vmem [thread:$0]  (%p2933_p4), %s4222_s17, %s4211_s12, %s4224_s18, %s4214_s14, %s4030_s13, %s4030_s13, %s4031_s28  }
  0x86 PF: > { %p4923_p6 = scmp.ne.s32.totalorder %s4919_s6, 0 }
  0x87   : > { %s4254_s15 = sand.u32 (!%p4923_p6), 1, %s3982_s21   ;;  %p4924_p9 = scmp.ne.s32.totalorder (!%p4923_p6), %s4917_s29, 0 }
  0x88   : > { %245 = sbr.rel (%p4923_p6) target bundleno = 900 (0x384), region = 40  ;;  %s2939_s16 = sshll.u32 (!%p4923_p6), %s4254_s15, 11 }
  0x89   : > { %s248_s20 = scalar_lea.sflag (!%p4923_p6), [#allocation4], %s4254_s15  ;;  %s4258_s25 = scalar_lea.vmem (!%p4923_p6), [#allocation3], %s2939_s16 }
  0x8f   : > { %3965 = dma.done.wait (%p4924_p9), %s248_s20, 32768  }
  0x90   : > { %3967 = vsyncadd (%p4924_p9), %s248_s20, 4294934528  ;;  %p4925_p4 = scmp.eq.s32.totalorder %s4084_s4, 0 }
  0x92   : > { %3969 = dma.done.wait (%p4925_p4), [#allocation6], 16416   ;;  %p4926_p12 = pmov %p4925_p4 }
  0x93   : > { %p4927_p0 = pmov %p4925_p4 }
  0x94   : > { %3971 = vsyncadd (%p4926_p12), [#allocation6], 4294950880 }
  0x95   : > { %3973 = dma.done.wait (%p4927_p0), [#allocation9], 32   ;;  %p4928_p2 = pmov %p4927_p0 }
  0x96   : > { %v3484_v1 = vld [vmem:[#allocation5 + $0x4] ss:$8 sps:$4 sm:$0xff]   ;;  %v3488_v3 = vld [vmem:[#allocation5] ss:$8 sps:$4 sm:$0xff]   ;;  %v3490_v5 = vld [vmem:[#allocation5 + $0x14] ss:$8 sps:$4 sm:$0xff]  }
  0x97   : > { %3975 = vsyncadd (%p4928_p2), [#allocation9], 4294967264  ;;  %v3486_v2 = vld [vmem:[#allocation5 + $0x204] ss:$8 sps:$4 sm:$0xff]   ;;  %1464 = vmatprep.subr.bf16.mxu1 %v3484_v1  ;;  %v3489_v4 = vld [vmem:[#allocation5 + $0x200] ss:$8 sps:$4 sm:$0xff]  }
  0x98   : > { %1850 = vmatprep.subr.bf16.mxu0 %v3486_v2  ;;  %1465 = vmatpush1.bf16.msra.mxu1 %v3488_v3  ;;  %v3492_v6 = vld [vmem:[#allocation5 + $0x214] ss:$8 sps:$4 sm:$0xff]   ;;  %v3494_v7 = vld [vmem:[#allocation5 + $0x10] ss:$8 sps:$4 sm:$0xff]   ;;  %v3496_v9 = vld [vmem:[#allocation5 + $0x24] ss:$8 sps:$4 sm:$0xff]  }
  0x99   : > { %1851 = vmatpush1.bf16.msra.mxu0 %v3489_v4  ;;  %1466 = vmatprep.subr.bf16.mxu1 %v3490_v5  ;;  %v3495_v8 = vld [vmem:[#allocation5 + $0x210] ss:$8 sps:$4 sm:$0xff]   ;;  %v3498_v10 = vld [vmem:[#allocation5 + $0x224] ss:$8 sps:$4 sm:$0xff]   ;;  %v3500_v11 = vld [vmem:[#allocation5 + $0x20] ss:$8 sps:$4 sm:$0xff]  }
  0x9a   : > { %1852 = vmatprep.subr.bf16.mxu0 %v3492_v6  ;;  %v3501_v12 = vld [vmem:[#allocation5 + $0x220] ss:$8 sps:$4 sm:$0xff]   ;;  %v3502_v13 = vld [vmem:[#allocation5 + $0x34] ss:$8 sps:$4 sm:$0xff]   ;;  %v3506_v15 = vld [vmem:[#allocation5 + $0x30] ss:$8 sps:$4 sm:$0xff]  }
  0x9b   : > { %v3504_v14 = vld [vmem:[#allocation5 + $0x234] ss:$8 sps:$4 sm:$0xff]   ;;  %v3507_v16 = vld [vmem:[#allocation5 + $0x230] ss:$8 sps:$4 sm:$0xff]   ;;  %v3508_v17 = vld [vmem:[#allocation5 + $0x44] ss:$8 sps:$4 sm:$0xff]  }
  0x9c   : > { %1467 = vmatpush1.bf16.msra.mxu1 %v3494_v7  ;;  %v3510_v18 = vld [vmem:[#allocation5 + $0x244] ss:$8 sps:$4 sm:$0xff]   ;;  %v3512_v19 = vld [vmem:[#allocation5 + $0x40] ss:$8 sps:$4 sm:$0xff]   ;;  %v3514_v21 = vld [vmem:[#allocation5 + $0x54] ss:$8 sps:$4 sm:$0xff]  }
  0x9d   : > { %1853 = vmatpush1.bf16.msra.mxu0 %v3495_v8  ;;  %1468 = vmatprep.subr.bf16.mxu1 %v3496_v9  ;;  %v3513_v20 = vld [vmem:[#allocation5 + $0x240] ss:$8 sps:$4 sm:$0xff]   ;;  %v3516_v22 = vld [vmem:[#allocation5 + $0x254] ss:$8 sps:$4 sm:$0xff]   ;;  %v3518_v23 = vld [vmem:[#allocation5 + $0x50] ss:$8 sps:$4 sm:$0xff]  }
  0x9e   : > { %1854 = vmatprep.subr.bf16.mxu0 %v3498_v10  ;;  %v3519_v24 = vld [vmem:[#allocation5 + $0x250] ss:$8 sps:$4 sm:$0xff]   ;;  %v3520_v25 = vld [vmem:[#allocation5 + $0x64] ss:$8 sps:$4 sm:$0xff]   ;;  %v3524_v27 = vld [vmem:[#allocation5 + $0x60] ss:$8 sps:$4 sm:$0xff]  }
  0x9f   : > { %v3522_v26 = vld [vmem:[#allocation5 + $0x264] ss:$8 sps:$4 sm:$0xff]   ;;  %v3525_v28 = vld [vmem:[#allocation5 + $0x260] ss:$8 sps:$4 sm:$0xff]   ;;  %v3526_v29 = vld [vmem:[#allocation5 + $0x74] ss:$8 sps:$4 sm:$0xff]  }
  0xa0   : > { %1469 = vmatpush1.bf16.msra.mxu1 %v3500_v11  ;;  %v3528_v30 = vld [vmem:[#allocation5 + $0x274] ss:$8 sps:$4 sm:$0xff]   ;;  %v3530_v31 = vld [vmem:[#allocation5 + $0x70] ss:$8 sps:$4 sm:$0xff]   ;;  %v3532_v33 = vld [vmem:[#allocation5 + $0x84] ss:$8 sps:$4 sm:$0xff]  }
  0xa1   : > { %1855 = vmatpush1.bf16.msra.mxu0 %v3501_v12  ;;  %1470 = vmatprep.subr.bf16.mxu1 %v3502_v13  ;;  %v3531_v32 = vld [vmem:[#allocation5 + $0x270] ss:$8 sps:$4 sm:$0xff]   ;;  %v3534_v34 = vld [vmem:[#allocation5 + $0x284] ss:$8 sps:$4 sm:$0xff]   ;;  %v3536_v35 = vld [vmem:[#allocation5 + $0x80] ss:$8 sps:$4 sm:$0xff]  }
  0xa2   : > { %1856 = vmatprep.subr.bf16.mxu0 %v3504_v14  ;;  %v3537_v36 = vld [vmem:[#allocation5 + $0x280] ss:$8 sps:$4 sm:$0xff]   ;;  %v3538_v37 = vld [vmem:[#allocation5 + $0x94] ss:$8 sps:$4 sm:$0xff]   ;;  %v3542_v39 = vld [vmem:[#allocation5 + $0x90] ss:$8 sps:$4 sm:$0xff]  }
  0xa3   : > { %v3540_v38 = vld [vmem:[#allocation5 + $0x294] ss:$8 sps:$4 sm:$0xff]   ;;  %v3543_v40 = vld [vmem:[#allocation5 + $0x290] ss:$8 sps:$4 sm:$0xff]   ;;  %v3544_v41 = vld [vmem:[#allocation5 + $0xa4] ss:$8 sps:$4 sm:$0xff]  }
  0xa4   : > { %1471 = vmatpush1.bf16.msra.mxu1 %v3506_v15  ;;  %v3546_v42 = vld [vmem:[#allocation5 + $0x2a4] ss:$8 sps:$4 sm:$0xff]   ;;  %v3548_v43 = vld [vmem:[#allocation5 + $0xa0] ss:$8 sps:$4 sm:$0xff]   ;;  %v3550_v45 = vld [vmem:[#allocation5 + $0xb4] ss:$8 sps:$4 sm:$0xff]  }
  0xa5   : > { %1857 = vmatpush1.bf16.msra.mxu0 %v3507_v16  ;;  %1472 = vmatprep.subr.bf16.mxu1 %v3508_v17  ;;  %v3549_v44 = vld [vmem:[#allocation5 + $0x2a0] ss:$8 sps:$4 sm:$0xff]   ;;  %v3552_v46 = vld [vmem:[#allocation5 + $0x2b4] ss:$8 sps:$4 sm:$0xff]   ;;  %v3554_v51 = vld [vmem:[#allocation5 + $0xb0] ss:$8 sps:$4 sm:$0xff]  }
  0xa6   : > { %1858 = vmatprep.subr.bf16.mxu0 %v3510_v18  ;;  %v301_v47 = vld [vmem:[%s4258_s25 + $0x8] sm:$0xff]  ;;  %v3555_v52 = vld [vmem:[#allocation5 + $0x2b0] ss:$8 sps:$4 sm:$0xff]   ;;  %v3562_v59 = vld [vmem:[#allocation5 + $0xd4] ss:$8 sps:$4 sm:$0xff]   ;;  %s2943_s29 = sshll.u32 %s4254_s15, 8 }
  0xa7   : > { %v309_v48 = vld [vmem:[%s4258_s25 + $0x48] sm:$0xff]  ;;  %v3564_v60 = vld [vmem:[#allocation5 + $0x2d4] ss:$8 sps:$4 sm:$0xff]   ;;  %v3566_v61 = vld [vmem:[#allocation5 + $0xd0] ss:$8 sps:$4 sm:$0xff]   ;;  %vm2511_vm0 = vcmask 7168  }
  0xa8   : > { %1473 = vmatpush1.bf16.msra.mxu1 %v3512_v19  ;;  %v305_v49 = vld [vmem:[%s4258_s25 + $0x28] sm:$0xff]  ;;  %v557_v53 = vpack.c.bf16 %v309_v48, %v301_v47  ;;  %v3567_v62 = vld [vmem:[#allocation5 + $0x2d0] ss:$8 sps:$4 sm:$0xff]   ;;  %v3574_v3 = vld [vmem:[#allocation5 + $0xf4] ss:$8 sps:$4 sm:$0xff]   ;;  %s4668_s6 = scalar_lea.vmem [#allocation10], %s2943_s29  }
  0xa9   : > { %1859 = vmatpush1.bf16.msra.mxu0 %v3513_v20  ;;  %1474 = vmatprep.subr.bf16.mxu1 %v3514_v21  ;;  %v313_v50 = vld [vmem:[%s4258_s25 + $0x68] sm:$0xff]  ;;  %v3576_v4 = vld [vmem:[#allocation5 + $0x2f4] ss:$8 sps:$4 sm:$0xff]   ;;  %v3578_v5 = vld [vmem:[#allocation5 + $0xf0] ss:$8 sps:$4 sm:$0xff]   ;;  %p4929_p8 = scmp.ne.s32.totalorder %s4918_s30, 0 }
  0xaa   : > { %1860 = vmatprep.subr.bf16.mxu0 %v3516_v22  ;;  %v561_v54 = vpack.c.bf16 %v313_v50, %v305_v49  ;;  %v3556_v55 = vld [vmem:[#allocation5 + $0xc4] ss:$8 sps:$4 sm:$0xff]   ;;  %1496 = vmatprep.mubr.bf16.mxu1 %v557_v53  ;;  %v3560_v57 = vld [vmem:[#allocation5 + $0xc0] ss:$8 sps:$4 sm:$0xff]   ;;  %v3579_v6 = vld [vmem:[#allocation5 + $0x2f0] ss:$8 sps:$4 sm:$0xff]  }
  0xab   : > { %v3558_v56 = vld [vmem:[#allocation5 + $0x2c4] ss:$8 sps:$4 sm:$0xff]   ;;  %v3561_v58 = vld [vmem:[#allocation5 + $0x2c0] ss:$8 sps:$4 sm:$0xff]   ;;  %v3603_v47 = vld [vmem:[#allocation5 + $0x334] ss:$8 sps:$4 sm:$0xff]  }
  0xac   : > { %1475 = vmatpush1.bf16.msra.mxu1 %v3518_v23  ;;  %1882 = vmatprep.mubr.bf16.mxu0 %v561_v54  ;;  %v3568_v63 = vld [vmem:[#allocation5 + $0xe4] ss:$8 sps:$4 sm:$0xff]   ;;  %v3572_v1 = vld [vmem:[#allocation5 + $0xe0] ss:$8 sps:$4 sm:$0xff]   ;;  %v3588_v23 = vld [vmem:[#allocation5 + $0x114] ss:$8 sps:$4 sm:$0xff]  }
  0xad   : > { %1861 = vmatpush1.bf16.msra.mxu0 %v3519_v24  ;;  %1476 = vmatprep.subr.bf16.mxu1 %v3520_v25  ;;  %v3570_v0 = vld [vmem:[#allocation5 + $0x2e4] ss:$8 sps:$4 sm:$0xff]   ;;  %v3573_v2 = vld [vmem:[#allocation5 + $0x2e0] ss:$8 sps:$4 sm:$0xff]   ;;  %v3598_v53 = vld [vmem:[#allocation5 + $0x130] ss:$8 sps:$4 sm:$0xff]  }
  0xae   : > { %1862 = vmatprep.subr.bf16.mxu0 %v3522_v26  ;;  %v300_v7 = vld [vmem:[%s4258_s25] sm:$0xff]  ;;  %v317_v13 = vld [vmem:[%s4258_s25 + $0x88] sm:$0xff]  ;;  %v3586_v26 = vld [vmem:[#allocation5 + $0x110] ss:$8 sps:$4 sm:$0xff]   ;;  %s3074_s12 = sshll.u32 (%p4929_p8), %s4084_s4, 5  ;;  %s3093_s14 = sshll.u32 (%p4929_p8), %s4084_s4, 8 }
  0xaf   : > { %v308_v8 = vld [vmem:[%s4258_s25 + $0x40] sm:$0xff]  ;;  %v325_v14 = vld [vmem:[%s4258_s25 + $0xc8] sm:$0xff]  ;;  %v3601_v54 = vld [vmem:[#allocation5 + $0x330] ss:$8 sps:$4 sm:$0xff]   ;;  %s2552_s17 = ssub.s32 (%p4929_p8), 42, %s3074_s12  ;;  %s4772_s23 = scalar_lea.vmem (%p4929_p8), %s4912_s5, %s3093_s14  }
  0xb0   : > { %1477 = vmatpush1.bf16.msra.mxu1 %v3524_v27  ;;  %v3582_v9 = vld [vmem:[#allocation5 + $0x104] ss:$8 sps:$4 sm:$0xff]   ;;  %v556_v17 = vpack.c.bf16 %v308_v8, %v300_v7  ;;  %v3580_v19 = vld [vmem:[#allocation5 + $0x100] ss:$8 sps:$4 sm:$0xff]   ;;  %v565_v21 = vpack.c.bf16 %v325_v14, %v317_v13  ;;  %p2553_p5 = scmp.lt.s32.totalorder (%p4929_p8), %s2552_s17, 32 }
  0xb1   : > { %1863 = vmatpush1.bf16.msra.mxu0 %v3525_v28  ;;  %1478 = vmatprep.subr.bf16.mxu1 %v3526_v29  ;;  %v304_v10 = vld [vmem:[%s4258_s25 + $0x20] sm:$0xff]  ;;  %v321_v15 = vld [vmem:[%s4258_s25 + $0xa8] sm:$0xff]  ;;  %v3591_v29 = vld [vmem:[#allocation5 + $0x314] ss:$8 sps:$4 sm:$0xff]  }
  0xb2   : > { %1864 = vmatprep.subr.bf16.mxu0 %v3528_v30  ;;  %v312_v11 = vld [vmem:[%s4258_s25 + $0x60] sm:$0xff]  ;;  %v329_v16 = vld [vmem:[%s4258_s25 + $0xe8] sm:$0xff]  ;;  %v3589_v30 = vld [vmem:[#allocation5 + $0x310] ss:$8 sps:$4 sm:$0xff]  }
  0xb3   : > { %v3585_v12 = vld [vmem:[#allocation5 + $0x304] ss:$8 sps:$4 sm:$0xff]   ;;  %v560_v18 = vpack.c.bf16 %v312_v11, %v304_v10  ;;  %v3583_v20 = vld [vmem:[#allocation5 + $0x300] ss:$8 sps:$4 sm:$0xff]   ;;  %v569_v22 = vpack.c.bf16 %v329_v16, %v321_v15  ;;  %v3613_v10 = vld [vmem:[#allocation5 + $0x350] ss:$8 sps:$4 sm:$0xff]  }
  0xb4   : > { %1479 = vmatpush1.bf16.msra.mxu1 %v3530_v31  ;;  %v316_v24 = vld [vmem:[%s4258_s25 + $0x80] sm:$0xff]  ;;  %v333_v31 = vld [vmem:[%s4258_s25 + $0x108] sm:$0xff] }
  0xb5   : > { %1865 = vmatpush1.bf16.msra.mxu0 %v3531_v32  ;;  %1480 = vmatprep.subr.bf16.mxu1 %v3532_v33  ;;  %v324_v25 = vld [vmem:[%s4258_s25 + $0xc0] sm:$0xff]  ;;  %v341_v32 = vld [vmem:[%s4258_s25 + $0x148] sm:$0xff] }
  0xb6   : > { %1866 = vmatprep.subr.bf16.mxu0 %v3534_v34  ;;  %v320_v27 = vld [vmem:[%s4258_s25 + $0xa0] sm:$0xff]  ;;  %v337_v33 = vld [vmem:[%s4258_s25 + $0x128] sm:$0xff] }
  0xb7   : > { %v328_v28 = vld [vmem:[%s4258_s25 + $0xe0] sm:$0xff]  ;;  %v345_v34 = vld [vmem:[%s4258_s25 + $0x168] sm:$0xff] }
  0xb8   : > { %1481 = vmatpush1.bf16.msra.mxu1 %v3536_v35  ;;  %v3594_v35 = vld [vmem:[#allocation5 + $0x124] ss:$8 sps:$4 sm:$0xff]  }
  0xb9   : > { %1867 = vmatpush1.bf16.msra.mxu0 %v3537_v36  ;;  %1482 = vmatprep.subr.bf16.mxu1 %v3538_v37  ;;  %v3597_v36 = vld [vmem:[#allocation5 + $0x324] ss:$8 sps:$4 sm:$0xff]   ;;  %v564_v37 = vpack.c.bf16 %v324_v25, %v316_v24 }
  0xba   : > { %1868 = vmatprep.subr.bf16.mxu0 %v3540_v38  ;;  %v568_v38 = vpack.c.bf16 %v328_v28, %v320_v27  ;;  %v344_v48 = vld [vmem:[%s4258_s25 + $0x160] sm:$0xff]  ;;  %v349_v49 = vld [vmem:[%s4258_s25 + $0x188] sm:$0xff] }
  0xbb   : > { %v357_v50 = vld [vmem:[%s4258_s25 + $0x1c8] sm:$0xff]  ;;  %v376_v24 = vld [vmem:[%s4258_s25 + $0x260] sm:$0xff] }
  0xbc   : > { %1483 = vmatpush1.bf16.msra.mxu1 %v3542_v39  ;;  %v573_v39 = vpack.c.bf16 %v341_v32, %v333_v31  ;;  %v369_v7 = vld [vmem:[%s4258_s25 + $0x228] sm:$0xff] }
  0xbd   : > { %1869 = vmatpush1.bf16.msra.mxu0 %v3543_v40  ;;  %1484 = vmatprep.subr.bf16.mxu1 %v3544_v41  ;;  %v577_v40 = vpack.c.bf16 %v345_v34, %v337_v33  ;;  %v3592_v41 = vld [vmem:[#allocation5 + $0x120] ss:$8 sps:$4 sm:$0xff]   ;;  %v3618_v11 = vld [vmem:[#allocation5 + $0x164] ss:$8 sps:$4 sm:$0xff]  }
  0xbe   : > { %1870 = vmatprep.subr.bf16.mxu0 %v3546_v42  ;;  %v3595_v42 = vld [vmem:[#allocation5 + $0x320] ss:$8 sps:$4 sm:$0xff]   ;;  %v3630_v31 = vld [vmem:[#allocation5 + $0x184] ss:$8 sps:$4 sm:$0xff]  }
  0xbf   : > { %v377_v8 = vld [vmem:[%s4258_s25 + $0x268] sm:$0xff] }
  0xc0   : > { %1485 = vmatpush1.bf16.msra.mxu1 %v3548_v43  ;;  %v332_v43 = vld [vmem:[%s4258_s25 + $0x100] sm:$0xff]  ;;  %v593_v16 = vpack.c.bf16 %v377_v8, %v369_v7  ;;  %v381_v25 = vld [vmem:[%s4258_s25 + $0x288] sm:$0xff] }
  0xc1   : > { %1871 = vmatpush1.bf16.msra.mxu0 %v3549_v44  ;;  %1486 = vmatprep.subr.bf16.mxu1 %v3550_v45  ;;  %v340_v44 = vld [vmem:[%s4258_s25 + $0x140] sm:$0xff]  ;;  %v385_v27 = vld [vmem:[%s4258_s25 + $0x2a8] sm:$0xff] }
  0xc2   : > { %1872 = vmatprep.subr.bf16.mxu0 %v3552_v46  ;;  %v336_v45 = vld [vmem:[%s4258_s25 + $0x120] sm:$0xff]  ;;  %v3600_v46 = vld [vmem:[#allocation5 + $0x134] ss:$8 sps:$4 sm:$0xff]   ;;  %v393_v28 = vld [vmem:[%s4258_s25 + $0x2e8] sm:$0xff] }
  0xc3   : > { %v3633_v32 = vld [vmem:[#allocation5 + $0x384] ss:$8 sps:$4 sm:$0xff]  }
  0xc4   : > { %1487 = vmatpush1.bf16.msra.mxu1 %v3554_v51  ;;  %v353_v51 = vld [vmem:[%s4258_s25 + $0x1a8] sm:$0xff] }
  0xc5   : > { %1873 = vmatpush1.bf16.msra.mxu0 %v3555_v52  ;;  %1488 = vmatprep.subr.bf16.mxu1 %v3556_v55  ;;  %v361_v52 = vld [vmem:[%s4258_s25 + $0x1e8] sm:$0xff] }
  0xc6   : > { %1874 = vmatprep.subr.bf16.mxu0 %v3558_v56  ;;  %v3606_v55 = vld [vmem:[#allocation5 + $0x144] ss:$8 sps:$4 sm:$0xff]  }
  0xc7   : > { %v3609_v56 = vld [vmem:[#allocation5 + $0x344] ss:$8 sps:$4 sm:$0xff]  }
  0xc8   : > { %1489 = vmatpush1.bf16.msra.mxu1 %v3560_v57  ;;  %v572_v57 = vpack.c.bf16 %v340_v44, %v332_v43  ;;  %v3639_v43 = vld [vmem:[#allocation5 + $0x394] ss:$8 sps:$4 sm:$0xff]   ;;  %v392_v44 = vld [vmem:[%s4258_s25 + $0x2e0] sm:$0xff] }
  0xc9   : > { %1875 = vmatpush1.bf16.msra.mxu0 %v3561_v58  ;;  %1490 = vmatprep.subr.bf16.mxu1 %v3562_v59  ;;  %v576_v58 = vpack.c.bf16 %v344_v48, %v336_v45  ;;  %v581_v59 = vpack.c.bf16 %v357_v50, %v349_v49  ;;  %v397_v45 = vld [vmem:[%s4258_s25 + $0x308] sm:$0xff]  ;;  %v3634_v49 = vld [vmem:[#allocation5 + $0x190] ss:$8 sps:$4 sm:$0xff]  }
  0xca   : > { %1876 = vmatprep.subr.bf16.mxu0 %v3564_v60  ;;  %v585_v60 = vpack.c.bf16 %v361_v52, %v353_v51  ;;  %v409_v48 = vld [vmem:[%s4258_s25 + $0x368] sm:$0xff]  ;;  %v3637_v50 = vld [vmem:[#allocation5 + $0x390] ss:$8 sps:$4 sm:$0xff]  }
  0xcb   : > { %v3642_v51 = vld [vmem:[#allocation5 + $0x1a4] ss:$8 sps:$4 sm:$0xff]  }
  0xcc   : > { %1491 = vmatpush1.bf16.msra.mxu1 %v3566_v61  ;;  %v3604_v61 = vld [vmem:[#allocation5 + $0x140] ss:$8 sps:$4 sm:$0xff]   ;;  %v3645_v52 = vld [vmem:[#allocation5 + $0x3a4] ss:$8 sps:$4 sm:$0xff]  }
  0xcd   : > { %1877 = vmatpush1.bf16.msra.mxu0 %v3567_v62  ;;  %1492 = vmatprep.subr.bf16.mxu1 %v3568_v63  ;;  %v3607_v62 = vld [vmem:[#allocation5 + $0x340] ss:$8 sps:$4 sm:$0xff]   ;;  %v3612_v63 = vld [vmem:[#allocation5 + $0x154] ss:$8 sps:$4 sm:$0xff]   ;;  %v3654_v7 = vld [vmem:[#allocation5 + $0x1c4] ss:$8 sps:$4 sm:$0xff]  }
  0xce   : > { %1878 = vmatprep.subr.bf16.mxu0 %v3570_v0  ;;  %v348_v0 = vld [vmem:[%s4258_s25 + $0x180] sm:$0xff] }
  0xd0   : > { %1493 = vmatpush1.bf16.msra.mxu1 %v3572_v1  ;;  %v356_v1 = vld [vmem:[%s4258_s25 + $0x1c0] sm:$0xff] }
  0xd1   : > { %1879 = vmatpush1.bf16.msra.mxu0 %v3573_v2  ;;  %1494 = vmatprep.subr.bf16.mxu1 %v3574_v3  ;;  %v352_v2 = vld [vmem:[%s4258_s25 + $0x1a0] sm:$0xff]  ;;  %v3615_v3 = vld [vmem:[#allocation5 + $0x354] ss:$8 sps:$4 sm:$0xff]   ;;  %v580_v13 = vpack.c.bf16 %v356_v1, %v348_v0  ;;  %v413_v1 = vld [vmem:[%s4258_s25 + $0x388] sm:$0xff] }
  0xd2   : > { %1880 = vmatprep.subr.bf16.mxu0 %v3576_v4  ;;  %v360_v4 = vld [vmem:[%s4258_s25 + $0x1e0] sm:$0xff] }
  0xd3   : > { %v584_v14 = vpack.c.bf16 %v360_v4, %v352_v2  ;;  %v408_v0 = vld [vmem:[%s4258_s25 + $0x360] sm:$0xff]  ;;  %v421_v2 = vld [vmem:[%s4258_s25 + $0x3c8] sm:$0xff] }
  0xd4   : > { %1495 = vmatpush1.bf16.msra.mxu1 %v3578_v5  ;;  %v365_v5 = vld [vmem:[%s4258_s25 + $0x208] sm:$0xff] }
  0xd5   : > { %1881 = vmatpush1.bf16.msra.mxu0 %v3579_v6  ;;  %1657 = vmatprep.subr.bf16.mxu1 %v3582_v9  ;;  %v373_v6 = vld [vmem:[%s4258_s25 + $0x248] sm:$0xff]  ;;  %v3610_v9 = vld [vmem:[#allocation5 + $0x150] ss:$8 sps:$4 sm:$0xff]  }
  0xd6   : > { %2043 = vmatprep.subr.bf16.mxu0 %v3585_v12  ;;  %v3621_v12 = vld [vmem:[#allocation5 + $0x364] ss:$8 sps:$4 sm:$0xff]   ;;  %v589_v15 = vpack.c.bf16 %v373_v6, %v365_v5  ;;  %v3646_v5 = vld [vmem:[#allocation5 + $0x1b0] ss:$8 sps:$4 sm:$0xff]  }
  0xd7   : > { %1497 = vmatmul.mubr.bf16.vlgmr.msra.gmra.mrb[0].mxu1 %v556_v17  ;;  %v3616_v17 = vld [vmem:[#allocation5 + $0x160] ss:$8 sps:$4 sm:$0xff]   ;;  %v3649_v6 = vld [vmem:[#allocation5 + $0x3b0] ss:$8 sps:$4 sm:$0xff]  }
  0xd8   : > { %1883 = vmatmul.mubr.bf16.vlgmr.msra.gmra.mrb[0].mxu0 %v560_v18  ;;  %1658 = vmatpush1.bf16.msra.mxu1 %v3580_v19  ;;  %v3619_v18 = vld [vmem:[#allocation5 + $0x360] ss:$8 sps:$4 sm:$0xff]  }
  0xd9   : > { %2044 = vmatpush1.bf16.msra.mxu0 %v3583_v20  ;;  %1506 = vmatprep.mubr.bf16.mxu1 %v565_v21  ;;  %v364_v19 = vld [vmem:[%s4258_s25 + $0x200] sm:$0xff]  ;;  %v425_v4 = vld [vmem:[%s4258_s25 + $0x3e8] sm:$0xff] }
  0xda   : > { %1892 = vmatprep.mubr.bf16.mxu0 %v569_v22  ;;  %1659 = vmatprep.subr.bf16.mxu1 %v3588_v23  ;;  %v372_v20 = vld [vmem:[%s4258_s25 + $0x240] sm:$0xff]  ;;  %v3624_v22 = vld [vmem:[#allocation5 + $0x174] ss:$8 sps:$4 sm:$0xff]  }
  0xdb   : > { %2045 = vmatprep.subr.bf16.mxu0 %v3591_v29  ;;  %v368_v21 = vld [vmem:[%s4258_s25 + $0x220] sm:$0xff]  ;;  %v3627_v23 = vld [vmem:[#allocation5 + $0x374] ss:$8 sps:$4 sm:$0xff]   ;;  %v3622_v29 = vld [vmem:[#allocation5 + $0x170] ss:$8 sps:$4 sm:$0xff]   ;;  %v588_v33 = vpack.c.bf16 %v372_v20, %v364_v19 }
  0xdc   : > { %1660 = vmatpush1.bf16.msra.mxu1 %v3586_v26  ;;  %v389_v26 = vld [vmem:[%s4258_s25 + $0x2c8] sm:$0xff]  ;;  %v592_v34 = vpack.c.bf16 %v376_v24, %v368_v21  ;;  %v3658_v24 = vld [vmem:[#allocation5 + $0x1d0] ss:$8 sps:$4 sm:$0xff]  }
  0xdd   : > { %2046 = vmatpush1.bf16.msra.mxu0 %v3589_v30  ;;  %1661 = vmatprep.subr.bf16.mxu1 %v3594_v35  ;;  %v3625_v30 = vld [vmem:[#allocation5 + $0x370] ss:$8 sps:$4 sm:$0xff]   ;;  %v597_v35 = vpack.c.bf16 %v389_v26, %v381_v25  ;;  %v429_v19 = vld [vmem:[%s4258_s25 + $0x408] sm:$0xff]  ;;  %v3663_v26 = vld [vmem:[#allocation5 + $0x3d4] ss:$8 sps:$4 sm:$0xff]  }
  0xde   : > { %2047 = vmatprep.subr.bf16.mxu0 %v3597_v36  ;;  %v601_v36 = vpack.c.bf16 %v393_v28, %v385_v27  ;;  %v437_v20 = vld [vmem:[%s4258_s25 + $0x448] sm:$0xff]  ;;  %v3661_v25 = vld [vmem:[#allocation5 + $0x3d0] ss:$8 sps:$4 sm:$0xff]  }
  0xdf   : > { %1507 = vmatmul.mubr.bf16.gmra.mrb[4].mxu1 %v564_v37  ;;  %v3628_v37 = vld [vmem:[#allocation5 + $0x180] ss:$8 sps:$4 sm:$0xff]  }
  0xe0   : > { %1893 = vmatmul.mubr.bf16.gmra.mrb[4].mxu0 %v568_v38  ;;  %1516 = vmatprep.mubr.bf16.mxu1 %v573_v39  ;;  %v3631_v38 = vld [vmem:[#allocation5 + $0x380] ss:$8 sps:$4 sm:$0xff]   ;;  %v3636_v39 = vld [vmem:[#allocation5 + $0x194] ss:$8 sps:$4 sm:$0xff]  }
  0xe1   : > { %1902 = vmatprep.mubr.bf16.mxu0 %v577_v40  ;;  %1662 = vmatpush1.bf16.msra.mxu1 %v3592_v41  ;;  %v380_v40 = vld [vmem:[%s4258_s25 + $0x280] sm:$0xff]  ;;  %v433_v21 = vld [vmem:[%s4258_s25 + $0x428] sm:$0xff] }
  0xe2   : > { %2048 = vmatpush1.bf16.msra.mxu0 %v3595_v42  ;;  %1663 = vmatprep.subr.bf16.mxu1 %v3600_v46  ;;  %v388_v41 = vld [vmem:[%s4258_s25 + $0x2c0] sm:$0xff]  ;;  %v405_v46 = vld [vmem:[%s4258_s25 + $0x348] sm:$0xff] }
  0xe3   : > { %2049 = vmatprep.subr.bf16.mxu0 %v3603_v47  ;;  %v384_v42 = vld [vmem:[%s4258_s25 + $0x2a0] sm:$0xff]  ;;  %v401_v47 = vld [vmem:[%s4258_s25 + $0x328] sm:$0xff] }
  0xe5   : > { %1664 = vmatpush1.bf16.msra.mxu1 %v3598_v53  ;;  %v596_v53 = vpack.c.bf16 %v388_v41, %v380_v40  ;;  %v453_v40 = vld [vmem:[%s4258_s25 + $0x4c8] sm:$0xff] }
  0xe6   : > { %2050 = vmatpush1.bf16.msra.mxu0 %v3601_v54  ;;  %1665 = vmatprep.subr.bf16.mxu1 %v3606_v55  ;;  %v600_v54 = vpack.c.bf16 %v392_v44, %v384_v42  ;;  %v605_v55 = vpack.c.bf16 %v405_v46, %v397_v45  ;;  %v449_v41 = vld [vmem:[%s4258_s25 + $0x4a8] sm:$0xff]  ;;  %v3672_v44 = vld [vmem:[#allocation5 + $0x1f4] ss:$8 sps:$4 sm:$0xff]  }
  0xe7   : > { %2051 = vmatprep.subr.bf16.mxu0 %v3609_v56  ;;  %1517 = vmatmul.mubr.bf16.gmra.mrb[8].mxu1 %v572_v57  ;;  %v609_v56 = vpack.c.bf16 %v409_v48, %v401_v47  ;;  %v3640_v57 = vld [vmem:[#allocation5 + $0x1a0] ss:$8 sps:$4 sm:$0xff]   ;;  %v3673_v47 = vld [vmem:[#allocation5 + $0x3f0] ss:$8 sps:$4 sm:$0xff]   ;;  %v3675_v48 = vld [vmem:[#allocation5 + $0x3f4] ss:$8 sps:$4 sm:$0xff]  }
  0xe8   : > { %1903 = vmatmul.mubr.bf16.gmra.mrb[8].mxu0 %v576_v58  ;;  %1526 = vmatprep.mubr.bf16.mxu1 %v581_v59  ;;  %v3643_v58 = vld [vmem:[#allocation5 + $0x3a0] ss:$8 sps:$4 sm:$0xff]  }
  0xe9   : > { %1912 = vmatprep.mubr.bf16.mxu0 %v585_v60  ;;  %1666 = vmatpush1.bf16.msra.mxu1 %v3604_v61  ;;  %v396_v59 = vld [vmem:[%s4258_s25 + $0x300] sm:$0xff]  ;;  %v457_v42 = vld [vmem:[%s4258_s25 + $0x4e8] sm:$0xff] }
  0xea   : > { %2052 = vmatpush1.bf16.msra.mxu0 %v3607_v62  ;;  %1667 = vmatprep.subr.bf16.mxu1 %v3612_v63  ;;  %v404_v60 = vld [vmem:[%s4258_s25 + $0x340] sm:$0xff]  ;;  %v3648_v62 = vld [vmem:[#allocation5 + $0x1b4] ss:$8 sps:$4 sm:$0xff]  }
  0xeb   : > { %2053 = vmatprep.subr.bf16.mxu0 %v3615_v3  ;;  %v400_v61 = vld [vmem:[%s4258_s25 + $0x320] sm:$0xff]  ;;  %v3651_v63 = vld [vmem:[#allocation5 + $0x3b4] ss:$8 sps:$4 sm:$0xff]   ;;  %v417_v3 = vld [vmem:[%s4258_s25 + $0x3a8] sm:$0xff]  ;;  %v604_v8 = vpack.c.bf16 %v404_v60, %v396_v59 }
  0xed   : > { %1668 = vmatpush1.bf16.msra.mxu1 %v3610_v9  ;;  %v608_v9 = vpack.c.bf16 %v408_v0, %v400_v61  ;;  %v468_v0 = vld [vmem:[%s4258_s25 + $0x540] sm:$0xff] }
  0xee   : > { %2054 = vmatpush1.bf16.msra.mxu0 %v3613_v10  ;;  %1669 = vmatprep.subr.bf16.mxu1 %v3618_v11  ;;  %v3657_v10 = vld [vmem:[#allocation5 + $0x3c4] ss:$8 sps:$4 sm:$0xff]   ;;  %v613_v11 = vpack.c.bf16 %v421_v2, %v413_v1 }
  0xef   : > { %2055 = vmatprep.subr.bf16.mxu0 %v3621_v12  ;;  %1527 = vmatmul.mubr.bf16.gmra.mrb[12].mxu1 %v580_v13  ;;  %v617_v12 = vpack.c.bf16 %v425_v4, %v417_v3  ;;  %v3652_v13 = vld [vmem:[#allocation5 + $0x1c0] ss:$8 sps:$4 sm:$0xff]  }
  0xf0   : > { %1913 = vmatmul.mubr.bf16.gmra.mrb[12].mxu0 %v584_v14  ;;  %1536 = vmatprep.mubr.bf16.mxu1 %v589_v15  ;;  %v3655_v14 = vld [vmem:[#allocation5 + $0x3c0] ss:$8 sps:$4 sm:$0xff]  }
  0xf1   : > { %1922 = vmatprep.mubr.bf16.mxu0 %v593_v16  ;;  %1670 = vmatpush1.bf16.msra.mxu1 %v3616_v17  ;;  %v412_v15 = vld [vmem:[%s4258_s25 + $0x380] sm:$0xff]  ;;  %v477_v3 = vld [vmem:[%s4258_s25 + $0x588] sm:$0xff] }
  0xf2   : > { %2056 = vmatpush1.bf16.msra.mxu0 %v3619_v18  ;;  %1671 = vmatprep.subr.bf16.mxu1 %v3624_v22  ;;  %v420_v16 = vld [vmem:[%s4258_s25 + $0x3c0] sm:$0xff]  ;;  %v3660_v22 = vld [vmem:[#allocation5 + $0x1d4] ss:$8 sps:$4 sm:$0xff]   ;;  %v485_v4 = vld [vmem:[%s4258_s25 + $0x5c8] sm:$0xff] }
  0xf3   : > { %2057 = vmatprep.subr.bf16.mxu0 %v3627_v23  ;;  %v416_v17 = vld [vmem:[%s4258_s25 + $0x3a0] sm:$0xff]  ;;  %v441_v23 = vld [vmem:[%s4258_s25 + $0x468] sm:$0xff]  ;;  %v612_v27 = vpack.c.bf16 %v420_v16, %v412_v15 }
  0xf4   : > { %v424_v18 = vld [vmem:[%s4258_s25 + $0x3e0] sm:$0xff]  ;;  %v493_v15 = vld [vmem:[%s4258_s25 + $0x608] sm:$0xff] }
  0xf5   : > { %1672 = vmatpush1.bf16.msra.mxu1 %v3622_v29  ;;  %v616_v28 = vpack.c.bf16 %v424_v18, %v416_v17  ;;  %v621_v29 = vpack.c.bf16 %v437_v20, %v429_v19  ;;  %v464_v1 = vld [vmem:[%s4258_s25 + $0x520] sm:$0xff]  ;;  %v501_v16 = vld [vmem:[%s4258_s25 + $0x648] sm:$0xff] }
  0xf6   : > { %2058 = vmatpush1.bf16.msra.mxu0 %v3625_v30  ;;  %1673 = vmatprep.subr.bf16.mxu1 %v3630_v31  ;;  %v625_v30 = vpack.c.bf16 %v441_v23, %v433_v21  ;;  %v3666_v31 = vld [vmem:[#allocation5 + $0x1e4] ss:$8 sps:$4 sm:$0xff]   ;;  %v653_v21 = vpack.c.bf16 %v501_v16, %v493_v15 }
  0xf7   : > { %2059 = vmatprep.subr.bf16.mxu0 %v3633_v32  ;;  %1537 = vmatmul.mubr.bf16.gmra.mrb[16].mxu1 %v588_v33  ;;  %v3664_v32 = vld [vmem:[#allocation5 + $0x1e0] ss:$8 sps:$4 sm:$0xff]  }
  0xf8   : > { %1923 = vmatmul.mubr.bf16.gmra.mrb[16].mxu0 %v592_v34  ;;  %1546 = vmatprep.mubr.bf16.mxu1 %v597_v35  ;;  %v428_v33 = vld [vmem:[%s4258_s25 + $0x400] sm:$0xff]  ;;  %v497_v17 = vld [vmem:[%s4258_s25 + $0x628] sm:$0xff] }
  0xf9   : > { %1932 = vmatprep.mubr.bf16.mxu0 %v601_v36  ;;  %1674 = vmatpush1.bf16.msra.mxu1 %v3628_v37  ;;  %v436_v34 = vld [vmem:[%s4258_s25 + $0x440] sm:$0xff]  ;;  %v505_v18 = vld [vmem:[%s4258_s25 + $0x668] sm:$0xff] }
  0xfa   : > { %2060 = vmatpush1.bf16.msra.mxu0 %v3631_v38  ;;  %1675 = vmatprep.subr.bf16.mxu1 %v3636_v39  ;;  %v432_v35 = vld [vmem:[%s4258_s25 + $0x420] sm:$0xff]  ;;  %v445_v39 = vld [vmem:[%s4258_s25 + $0x488] sm:$0xff]  ;;  %v620_v45 = vpack.c.bf16 %v436_v34, %v428_v33 }
  0xfb   : > { %2061 = vmatprep.subr.bf16.mxu0 %v3639_v43  ;;  %v3667_v36 = vld [vmem:[#allocation5 + $0x3e0] ss:$8 sps:$4 sm:$0xff]   ;;  %v3669_v37 = vld [vmem:[#allocation5 + $0x3e4] ss:$8 sps:$4 sm:$0xff]   ;;  %v3670_v43 = vld [vmem:[#allocation5 + $0x1f0] ss:$8 sps:$4 sm:$0xff]  }
  0xfc   : > { %v440_v38 = vld [vmem:[%s4258_s25 + $0x460] sm:$0xff] }
  0xfd   : > { %1676 = vmatpush1.bf16.msra.mxu1 %v3634_v49  ;;  %v624_v46 = vpack.c.bf16 %v440_v38, %v432_v35  ;;  %v629_v49 = vpack.c.bf16 %v453_v40, %v445_v39  ;;  %v472_v2 = vld [vmem:[%s4258_s25 + $0x560] sm:$0xff]  ;;  %v525_v39 = vld [vmem:[%s4258_s25 + $0x708] sm:$0xff] }
  0xfe   : > { %2062 = vmatpush1.bf16.msra.mxu0 %v3637_v50  ;;  %1677 = vmatprep.subr.bf16.mxu1 %v3642_v51  ;;  %v633_v50 = vpack.c.bf16 %v457_v42, %v449_v41  ;;  %v444_v51 = vld [vmem:[%s4258_s25 + $0x480] sm:$0xff]  ;;  %v533_v40 = vld [vmem:[%s4258_s25 + $0x748] sm:$0xff] }
  0xff   : > { %2063 = vmatprep.subr.bf16.mxu0 %v3645_v52  ;;  %1547 = vmatmul.mubr.bf16.gmra.mrb[20].mxu1 %v596_v53  ;;  %v452_v52 = vld [vmem:[%s4258_s25 + $0x4c0] sm:$0xff]  ;;  %v529_v41 = vld [vmem:[%s4258_s25 + $0x728] sm:$0xff] }
 0x100   : > { %1933 = vmatmul.mubr.bf16.gmra.mrb[20].mxu0 %v600_v54  ;;  %1556 = vmatprep.mubr.bf16.mxu1 %v605_v55  ;;  %v448_v53 = vld [vmem:[%s4258_s25 + $0x4a0] sm:$0xff]  ;;  %v461_v55 = vld [vmem:[%s4258_s25 + $0x508] sm:$0xff]  ;;  %v628_v59 = vpack.c.bf16 %v452_v52, %v444_v51 }
 0x101   : > { %1942 = vmatprep.mubr.bf16.mxu0 %v609_v56  ;;  %1678 = vmatpush1.bf16.msra.mxu1 %v3640_v57  ;;  %v456_v54 = vld [vmem:[%s4258_s25 + $0x4e0] sm:$0xff]  ;;  %v469_v56 = vld [vmem:[%s4258_s25 + $0x548] sm:$0xff] }
 0x102   : > { %2064 = vmatpush1.bf16.msra.mxu0 %v3643_v58  ;;  %1679 = vmatprep.subr.bf16.mxu1 %v3648_v62  ;;  %v465_v57 = vld [vmem:[%s4258_s25 + $0x528] sm:$0xff]  ;;  %v632_v60 = vpack.c.bf16 %v456_v54, %v448_v53  ;;  %v637_v61 = vpack.c.bf16 %v469_v56, %v461_v55  ;;  %v492_v23 = vld [vmem:[%s4258_s25 + $0x600] sm:$0xff] }
 0x103   : > { %2065 = vmatprep.subr.bf16.mxu0 %v3651_v63  ;;  %v473_v58 = vld [vmem:[%s4258_s25 + $0x568] sm:$0xff]  ;;  %v460_v63 = vld [vmem:[%s4258_s25 + $0x500] sm:$0xff] }
 0x104   : > { %v641_v62 = vpack.c.bf16 %v473_v58, %v465_v57  ;;  %v508_v35 = vld [vmem:[%s4258_s25 + $0x680] sm:$0xff]  ;;  %v537_v42 = vld [vmem:[%s4258_s25 + $0x768] sm:$0xff] }
 0x105   : > { %1680 = vmatpush1.bf16.msra.mxu1 %v3646_v5  ;;  %v481_v5 = vld [vmem:[%s4258_s25 + $0x5a8] sm:$0xff]  ;;  %v520_v38 = vld [vmem:[%s4258_s25 + $0x6e0] sm:$0xff] }
 0x106   : > { %2066 = vmatpush1.bf16.msra.mxu0 %v3649_v6  ;;  %1681 = vmatprep.subr.bf16.mxu1 %v3654_v7  ;;  %v489_v6 = vld [vmem:[%s4258_s25 + $0x5e8] sm:$0xff]  ;;  %v636_v7 = vpack.c.bf16 %v468_v0, %v460_v63  ;;  %v303_v63 = vld [vmem:[%s4258_s25 + $0x18] sm:$0xff] }
 0x107   : > { %2067 = vmatprep.subr.bf16.mxu0 %v3657_v10  ;;  %1557 = vmatmul.mubr.bf16.gmra.mrb[24].mxu1 %v604_v8  ;;  %v640_v8 = vpack.c.bf16 %v472_v2, %v464_v1  ;;  %v649_v10 = vpack.c.bf16 %v489_v6, %v481_v5  ;;  %v541_v51 = vld [vmem:[%s4258_s25 + $0x788] sm:$0xff]  ;;  %v311_v0 = vld [vmem:[%s4258_s25 + $0x58] sm:$0xff] }
 0x108   : > { %1943 = vmatmul.mubr.bf16.gmra.mrb[24].mxu0 %v608_v9  ;;  %1566 = vmatprep.mubr.bf16.mxu1 %v613_v11  ;;  %v645_v9 = vpack.c.bf16 %v485_v4, %v477_v3  ;;  %v476_v11 = vld [vmem:[%s4258_s25 + $0x580] sm:$0xff]  ;;  %v549_v52 = vld [vmem:[%s4258_s25 + $0x7c8] sm:$0xff]  ;;  %v307_v1 = vld [vmem:[%s4258_s25 + $0x38] sm:$0xff]  ;;  %v559_v5 = vpack.c.bf16 %v311_v0, %v303_v63 }
 0x109   : > { %1952 = vmatprep.mubr.bf16.mxu0 %v617_v12  ;;  %1682 = vmatpush1.bf16.msra.mxu1 %v3652_v13  ;;  %v484_v12 = vld [vmem:[%s4258_s25 + $0x5c0] sm:$0xff]  ;;  %v545_v53 = vld [vmem:[%s4258_s25 + $0x7a8] sm:$0xff]  ;;  %v677_v57 = vpack.c.bf16 %v549_v52, %v541_v51  ;;  %v315_v2 = vld [vmem:[%s4258_s25 + $0x78] sm:$0xff] }
 0x10a   : > { %2068 = vmatpush1.bf16.msra.mxu0 %v3655_v14  ;;  %1683 = vmatprep.subr.bf16.mxu1 %v3660_v22  ;;  %v480_v13 = vld [vmem:[%s4258_s25 + $0x5a0] sm:$0xff]  ;;  %v644_v19 = vpack.c.bf16 %v484_v12, %v476_v11  ;;  %v657_v22 = vpack.c.bf16 %v505_v18, %v497_v17  ;;  %v553_v54 = vld [vmem:[%s4258_s25 + $0x7e8] sm:$0xff]  ;;  %v563_v6 = vpack.c.bf16 %v315_v2, %v307_v1  ;;  %v319_v11 = vld [vmem:[%s4258_s25 + $0x98] sm:$0xff] }
 0x10b   : > { %2069 = vmatprep.subr.bf16.mxu0 %v3663_v26  ;;  %v488_v14 = vld [vmem:[%s4258_s25 + $0x5e0] sm:$0xff]  ;;  %v681_v58 = vpack.c.bf16 %v553_v54, %v545_v53  ;;  %v327_v12 = vld [vmem:[%s4258_s25 + $0xd8] sm:$0xff] }
 0x10c   : > { %v648_v20 = vpack.c.bf16 %v488_v14, %v480_v13  ;;  %v504_v26 = vld [vmem:[%s4258_s25 + $0x660] sm:$0xff]  ;;  %v323_v13 = vld [vmem:[%s4258_s25 + $0xb8] sm:$0xff]  ;;  %v567_v17 = vpack.c.bf16 %v327_v12, %v319_v11 }
 0x10d   : > { %1684 = vmatpush1.bf16.msra.mxu1 %v3658_v24  ;;  %v500_v24 = vld [vmem:[%s4258_s25 + $0x640] sm:$0xff]  ;;  %v331_v14 = vld [vmem:[%s4258_s25 + $0xf8] sm:$0xff] }
 0x10e   : > { %2070 = vmatpush1.bf16.msra.mxu0 %v3661_v25  ;;  %1685 = vmatprep.subr.bf16.mxu1 %v3666_v31  ;;  %v496_v25 = vld [vmem:[%s4258_s25 + $0x620] sm:$0xff]  ;;  %v652_v31 = vpack.c.bf16 %v500_v24, %v492_v23  ;;  %v571_v18 = vpack.c.bf16 %v331_v14, %v323_v13  ;;  %v335_v23 = vld [vmem:[%s4258_s25 + $0x118] sm:$0xff] }
 0x10f   : > { %1567 = vmatmul.mubr.bf16.gmra.mrb[28].mxu1 %v612_v27  ;;  %2071 = vmatprep.subr.bf16.mxu0 %v3669_v37  ;;  %v509_v27 = vld [vmem:[%s4258_s25 + $0x688] sm:$0xff]  ;;  %v512_v37 = vld [vmem:[%s4258_s25 + $0x6a0] sm:$0xff]  ;;  %v343_v24 = vld [vmem:[%s4258_s25 + $0x158] sm:$0xff] }
 0x110   : > { %1953 = vmatmul.mubr.bf16.gmra.mrb[28].mxu0 %v616_v28  ;;  %1576 = vmatprep.mubr.bf16.mxu1 %v621_v29  ;;  %v517_v28 = vld [vmem:[%s4258_s25 + $0x6c8] sm:$0xff] }
 0x111   : > { %1962 = vmatprep.mubr.bf16.mxu0 %v625_v30  ;;  %1686 = vmatpush1.bf16.msra.mxu1 %v3664_v32  ;;  %v513_v29 = vld [vmem:[%s4258_s25 + $0x6a8] sm:$0xff]  ;;  %v656_v32 = vpack.c.bf16 %v504_v26, %v496_v25  ;;  %v661_v33 = vpack.c.bf16 %v517_v28, %v509_v27  ;;  %v339_v25 = vld [vmem:[%s4258_s25 + $0x138] sm:$0xff] }
 0x112   : > { %2072 = vmatpush1.bf16.msra.mxu0 %v3667_v36  ;;  %1687 = vmatprep.subr.bf16.mxu1 %v3672_v44  ;;  %v521_v30 = vld [vmem:[%s4258_s25 + $0x6e8] sm:$0xff]  ;;  %v516_v36 = vld [vmem:[%s4258_s25 + $0x6c0] sm:$0xff]  ;;  %v664_v44 = vpack.c.bf16 %v520_v38, %v512_v37  ;;  %v347_v26 = vld [vmem:[%s4258_s25 + $0x178] sm:$0xff] }
 0x113   : > { %2073 = vmatprep.subr.bf16.mxu0 %v3675_v48  ;;  %v665_v34 = vpack.c.bf16 %v521_v30, %v513_v29  ;;  %v532_v48 = vld [vmem:[%s4258_s25 + $0x740] sm:$0xff]  ;;  %v575_v29 = vpack.c.bf16 %v343_v24, %v335_v23  ;;  %v579_v30 = vpack.c.bf16 %v347_v26, %v339_v25  ;;  %v355_v37 = vld [vmem:[%s4258_s25 + $0x1b8] sm:$0xff] }
 0x114   : > { %v363_v38 = vld [vmem:[%s4258_s25 + $0x1f8] sm:$0xff] }
 0x115   : > { %1688 = vmatpush1.bf16.msra.mxu1 %v3670_v43  ;;  %v660_v43 = vpack.c.bf16 %v516_v36, %v508_v35  ;;  %v351_v35 = vld [vmem:[%s4258_s25 + $0x198] sm:$0xff] }
 0x116   : > { %2074 = vmatpush1.bf16.msra.mxu0 %v3673_v47  ;;  %v524_v47 = vld [vmem:[%s4258_s25 + $0x700] sm:$0xff]  ;;  %v359_v36 = vld [vmem:[%s4258_s25 + $0x1d8] sm:$0xff] }
 0x117   : > { %1577 = vmatmul.mubr.bf16.gmra.mrb[32].mxu1 %v620_v45  ;;  %v669_v45 = vpack.c.bf16 %v533_v40, %v525_v39  ;;  %v668_v55 = vpack.c.bf16 %v532_v48, %v524_v47  ;;  %v367_v47 = vld [vmem:[%s4258_s25 + $0x218] sm:$0xff] }
 0x118   : > { %1963 = vmatmul.mubr.bf16.gmra.mrb[32].mxu0 %v624_v46  ;;  %1586 = vmatprep.mubr.bf16.mxu1 %v629_v49  ;;  %v673_v46 = vpack.c.bf16 %v537_v42, %v529_v41  ;;  %v528_v49 = vld [vmem:[%s4258_s25 + $0x720] sm:$0xff]  ;;  %v583_v41 = vpack.c.bf16 %v359_v36, %v351_v35  ;;  %v587_v42 = vpack.c.bf16 %v363_v38, %v355_v37  ;;  %v375_v48 = vld [vmem:[%s4258_s25 + $0x258] sm:$0xff] }
 0x119   : > { %1972 = vmatprep.mubr.bf16.mxu0 %v633_v50  ;;  %v536_v50 = vld [vmem:[%s4258_s25 + $0x760] sm:$0xff]  ;;  %v591_v53 = vpack.c.bf16 %v375_v48, %v367_v47 }
 0x11a   : > { %v672_v56 = vpack.c.bf16 %v536_v50, %v528_v49  ;;  %v371_v49 = vld [vmem:[%s4258_s25 + $0x238] sm:$0xff] }
 0x11b   : > { %v379_v50 = vld [vmem:[%s4258_s25 + $0x278] sm:$0xff] }
 0x11c   : > { %v595_v54 = vpack.c.bf16 %v379_v50, %v371_v49 }
 0x11f   : > { %1587 = vmatmul.mubr.bf16.gmra.mrb[36].mxu1 %v628_v59  ;;  %v540_v59 = vld [vmem:[%s4258_s25 + $0x780] sm:$0xff] }
 0x120   : > { %1973 = vmatmul.mubr.bf16.gmra.mrb[36].mxu0 %v632_v60  ;;  %1596 = vmatprep.mubr.bf16.mxu1 %v637_v61  ;;  %v548_v60 = vld [vmem:[%s4258_s25 + $0x7c0] sm:$0xff] }
 0x121   : > { %1982 = vmatprep.mubr.bf16.mxu0 %v641_v62  ;;  %v544_v61 = vld [vmem:[%s4258_s25 + $0x7a0] sm:$0xff]  ;;  %v676_v3 = vpack.c.bf16 %v548_v60, %v540_v59  ;;  %v383_v59 = vld [vmem:[%s4258_s25 + $0x298] sm:$0xff] }
 0x122   : > { %v552_v62 = vld [vmem:[%s4258_s25 + $0x7e0] sm:$0xff]  ;;  %v391_v60 = vld [vmem:[%s4258_s25 + $0x2d8] sm:$0xff] }
 0x123   : > { %v680_v4 = vpack.c.bf16 %v552_v62, %v544_v61  ;;  %v387_v61 = vld [vmem:[%s4258_s25 + $0x2b8] sm:$0xff]  ;;  %v599_v1 = vpack.c.bf16 %v391_v60, %v383_v59 }
 0x124   : > { %v395_v62 = vld [vmem:[%s4258_s25 + $0x2f8] sm:$0xff] }
 0x125   : > { %v603_v2 = vpack.c.bf16 %v395_v62, %v387_v61 }
 0x127   : > { %1597 = vmatmul.mubr.bf16.gmra.mrb[40].mxu1 %v636_v7  ;;  %v302_v7 = vld [vmem:[%s4258_s25 + $0x10] sm:$0xff] }
 0x128   : > { %1983 = vmatmul.mubr.bf16.gmra.mrb[40].mxu0 %v640_v8  ;;  %1606 = vmatprep.mubr.bf16.mxu1 %v645_v9  ;;  %v310_v8 = vld [vmem:[%s4258_s25 + $0x50] sm:$0xff] }
 0x129   : > { %1992 = vmatprep.mubr.bf16.mxu0 %v649_v10  ;;  %v306_v9 = vld [vmem:[%s4258_s25 + $0x30] sm:$0xff]  ;;  %v558_v15 = vpack.c.bf16 %v310_v8, %v302_v7  ;;  %v399_v7 = vld [vmem:[%s4258_s25 + $0x318] sm:$0xff] }
 0x12a   : > { %v314_v10 = vld [vmem:[%s4258_s25 + $0x70] sm:$0xff]  ;;  %v407_v8 = vld [vmem:[%s4258_s25 + $0x358] sm:$0xff] }
 0x12b   : > { %v562_v16 = vpack.c.bf16 %v314_v10, %v306_v9  ;;  %v403_v9 = vld [vmem:[%s4258_s25 + $0x338] sm:$0xff]  ;;  %v607_v13 = vpack.c.bf16 %v407_v8, %v399_v7 }
 0x12c   : > { %v411_v10 = vld [vmem:[%s4258_s25 + $0x378] sm:$0xff] }
 0x12d   : > { %v611_v14 = vpack.c.bf16 %v411_v10, %v403_v9 }
 0x12f   : > { %1607 = vmatmul.mubr.bf16.gmra.mrb[44].mxu1 %v644_v19  ;;  %v318_v19 = vld [vmem:[%s4258_s25 + $0x90] sm:$0xff] }
 0x130   : > { %1993 = vmatmul.mubr.bf16.gmra.mrb[44].mxu0 %v648_v20  ;;  %1616 = vmatprep.mubr.bf16.mxu1 %v653_v21  ;;  %v326_v20 = vld [vmem:[%s4258_s25 + $0xd0] sm:$0xff] }
 0x131   : > { %2002 = vmatprep.mubr.bf16.mxu0 %v657_v22  ;;  %v322_v21 = vld [vmem:[%s4258_s25 + $0xb0] sm:$0xff]  ;;  %v566_v27 = vpack.c.bf16 %v326_v20, %v318_v19  ;;  %v415_v19 = vld [vmem:[%s4258_s25 + $0x398] sm:$0xff] }
 0x132   : > { %v330_v22 = vld [vmem:[%s4258_s25 + $0xf0] sm:$0xff]  ;;  %v423_v20 = vld [vmem:[%s4258_s25 + $0x3d8] sm:$0xff] }
 0x133   : > { %v570_v28 = vpack.c.bf16 %v330_v22, %v322_v21  ;;  %v419_v21 = vld [vmem:[%s4258_s25 + $0x3b8] sm:$0xff]  ;;  %v615_v25 = vpack.c.bf16 %v423_v20, %v415_v19 }
 0x134   : > { %v427_v22 = vld [vmem:[%s4258_s25 + $0x3f8] sm:$0xff] }
 0x135   : > { %v619_v26 = vpack.c.bf16 %v427_v22, %v419_v21 }
 0x137   : > { %1617 = vmatmul.mubr.bf16.gmra.mrb[48].mxu1 %v652_v31  ;;  %v334_v31 = vld [vmem:[%s4258_s25 + $0x110] sm:$0xff] }
 0x138   : > { %2003 = vmatmul.mubr.bf16.gmra.mrb[48].mxu0 %v656_v32  ;;  %1626 = vmatprep.mubr.bf16.mxu1 %v661_v33  ;;  %v342_v32 = vld [vmem:[%s4258_s25 + $0x150] sm:$0xff] }
 0x139   : > { %2012 = vmatprep.mubr.bf16.mxu0 %v665_v34  ;;  %v338_v33 = vld [vmem:[%s4258_s25 + $0x130] sm:$0xff]  ;;  %v574_v39 = vpack.c.bf16 %v342_v32, %v334_v31  ;;  %v431_v31 = vld [vmem:[%s4258_s25 + $0x418] sm:$0xff] }
 0x13a   : > { %v346_v34 = vld [vmem:[%s4258_s25 + $0x170] sm:$0xff]  ;;  %v439_v32 = vld [vmem:[%s4258_s25 + $0x458] sm:$0xff] }
 0x13b   : > { %v578_v40 = vpack.c.bf16 %v346_v34, %v338_v33  ;;  %v435_v33 = vld [vmem:[%s4258_s25 + $0x438] sm:$0xff]  ;;  %v623_v37 = vpack.c.bf16 %v439_v32, %v431_v31 }
 0x13c   : > { %v443_v34 = vld [vmem:[%s4258_s25 + $0x478] sm:$0xff] }
 0x13d   : > { %v627_v38 = vpack.c.bf16 %v443_v34, %v435_v33 }
 0x13f   : > { %1627 = vmatmul.mubr.bf16.gmra.mrb[52].mxu1 %v660_v43  ;;  %v350_v43 = vld [vmem:[%s4258_s25 + $0x190] sm:$0xff] }
 0x140   : > { %2013 = vmatmul.mubr.bf16.gmra.mrb[52].mxu0 %v664_v44  ;;  %1636 = vmatprep.mubr.bf16.mxu1 %v669_v45  ;;  %v358_v44 = vld [vmem:[%s4258_s25 + $0x1d0] sm:$0xff] }
 0x141   : > { %2022 = vmatprep.mubr.bf16.mxu0 %v673_v46  ;;  %v354_v45 = vld [vmem:[%s4258_s25 + $0x1b0] sm:$0xff]  ;;  %v582_v51 = vpack.c.bf16 %v358_v44, %v350_v43  ;;  %v447_v43 = vld [vmem:[%s4258_s25 + $0x498] sm:$0xff] }
 0x142   : > { %v362_v46 = vld [vmem:[%s4258_s25 + $0x1f0] sm:$0xff]  ;;  %v455_v44 = vld [vmem:[%s4258_s25 + $0x4d8] sm:$0xff] }
 0x143   : > { %v586_v52 = vpack.c.bf16 %v362_v46, %v354_v45  ;;  %v451_v45 = vld [vmem:[%s4258_s25 + $0x4b8] sm:$0xff]  ;;  %v631_v49 = vpack.c.bf16 %v455_v44, %v447_v43 }
 0x144   : > { %v459_v46 = vld [vmem:[%s4258_s25 + $0x4f8] sm:$0xff] }
 0x145   : > { %v635_v50 = vpack.c.bf16 %v459_v46, %v451_v45 }
 0x147   : > { %1637 = vmatmul.mubr.bf16.gmra.mrb[56].mxu1 %v668_v55  ;;  %v366_v55 = vld [vmem:[%s4258_s25 + $0x210] sm:$0xff] }
 0x148   : > { %2023 = vmatmul.mubr.bf16.gmra.mrb[56].mxu0 %v672_v56  ;;  %1646 = vmatprep.mubr.bf16.mxu1 %v677_v57  ;;  %v374_v56 = vld [vmem:[%s4258_s25 + $0x250] sm:$0xff] }
 0x149   : > { %2032 = vmatprep.mubr.bf16.mxu0 %v681_v58  ;;  %v370_v57 = vld [vmem:[%s4258_s25 + $0x230] sm:$0xff]  ;;  %v590_v63 = vpack.c.bf16 %v374_v56, %v366_v55  ;;  %v463_v55 = vld [vmem:[%s4258_s25 + $0x518] sm:$0xff] }
 0x14a   : > { %v378_v58 = vld [vmem:[%s4258_s25 + $0x270] sm:$0xff]  ;;  %v471_v56 = vld [vmem:[%s4258_s25 + $0x558] sm:$0xff] }
 0x14b   : > { %v594_v0 = vpack.c.bf16 %v378_v58, %v370_v57  ;;  %v467_v57 = vld [vmem:[%s4258_s25 + $0x538] sm:$0xff]  ;;  %v639_v61 = vpack.c.bf16 %v471_v56, %v463_v55 }
 0x14c   : > { %v475_v58 = vld [vmem:[%s4258_s25 + $0x578] sm:$0xff] }
 0x14d   : > { %v643_v62 = vpack.c.bf16 %v475_v58, %v467_v57 }
 0x14f   : > { %1647 = vmatmul.mubr.bf16.gmra.mrb[60].mxu1 %v676_v3  ;;  %v382_v3 = vld [vmem:[%s4258_s25 + $0x290] sm:$0xff] }
 0x150   : > { %2033 = vmatmul.mubr.bf16.gmra.mrb[60].mxu0 %v680_v4  ;;  %1689 = vmatprep.mubr.bf16.mxu1 %v559_v5  ;;  %v390_v4 = vld [vmem:[%s4258_s25 + $0x2d0] sm:$0xff] }
 0x151   : > { %2075 = vmatprep.mubr.bf16.mxu0 %v563_v6  ;;  %v386_v5 = vld [vmem:[%s4258_s25 + $0x2b0] sm:$0xff]  ;;  %v598_v11 = vpack.c.bf16 %v390_v4, %v382_v3  ;;  %v479_v3 = vld [vmem:[%s4258_s25 + $0x598] sm:$0xff] }
 0x152   : > { %v394_v6 = vld [vmem:[%s4258_s25 + $0x2f0] sm:$0xff]  ;;  %v487_v4 = vld [vmem:[%s4258_s25 + $0x5d8] sm:$0xff] }
 0x153   : > { %v602_v12 = vpack.c.bf16 %v394_v6, %v386_v5  ;;  %v483_v5 = vld [vmem:[%s4258_s25 + $0x5b8] sm:$0xff]  ;;  %v647_v9 = vpack.c.bf16 %v487_v4, %v479_v3  ;;  %v812_v4 = vld [vmem:[#allocation7] sm:$0x3] }
 0x154   : > { %v491_v6 = vld [vmem:[%s4258_s25 + $0x5f8] sm:$0xff] }
 0x155   : > { %v651_v10 = vpack.c.bf16 %v491_v6, %v483_v5 }
 0x157   : > { %1690 = vmatmul.mubr.bf16.vlgmr.msra.gmra.mrb[0].mxu1 %v558_v15  ;;  %v398_v15 = vld [vmem:[%s4258_s25 + $0x310] sm:$0xff] }
 0x158   : > { %2076 = vmatmul.mubr.bf16.vlgmr.msra.gmra.mrb[0].mxu0 %v562_v16  ;;  %1699 = vmatprep.mubr.bf16.mxu1 %v567_v17  ;;  %v406_v16 = vld [vmem:[%s4258_s25 + $0x350] sm:$0xff] }
 0x159   : > { %2085 = vmatprep.mubr.bf16.mxu0 %v571_v18  ;;  %v402_v17 = vld [vmem:[%s4258_s25 + $0x330] sm:$0xff]  ;;  %v606_v23 = vpack.c.bf16 %v406_v16, %v398_v15  ;;  %v495_v15 = vld [vmem:[%s4258_s25 + $0x618] sm:$0xff] }
 0x15a   : > { %v410_v18 = vld [vmem:[%s4258_s25 + $0x370] sm:$0xff]  ;;  %v503_v16 = vld [vmem:[%s4258_s25 + $0x658] sm:$0xff] }
 0x15b   : > { %v610_v24 = vpack.c.bf16 %v410_v18, %v402_v17  ;;  %v499_v17 = vld [vmem:[%s4258_s25 + $0x638] sm:$0xff]  ;;  %v655_v21 = vpack.c.bf16 %v503_v16, %v495_v15 }
 0x15c   : > { %v507_v18 = vld [vmem:[%s4258_s25 + $0x678] sm:$0xff] }
 0x15d   : > { %v659_v22 = vpack.c.bf16 %v507_v18, %v499_v17 }
 0x15f   : > { %1700 = vmatmul.mubr.bf16.gmra.mrb[4].mxu1 %v566_v27  ;;  %v414_v27 = vld [vmem:[%s4258_s25 + $0x390] sm:$0xff] }
 0x160   : > { %2086 = vmatmul.mubr.bf16.gmra.mrb[4].mxu0 %v570_v28  ;;  %1709 = vmatprep.mubr.bf16.mxu1 %v575_v29  ;;  %v422_v28 = vld [vmem:[%s4258_s25 + $0x3d0] sm:$0xff] }
 0x161   : > { %2095 = vmatprep.mubr.bf16.mxu0 %v579_v30  ;;  %v418_v29 = vld [vmem:[%s4258_s25 + $0x3b0] sm:$0xff]  ;;  %v614_v35 = vpack.c.bf16 %v422_v28, %v414_v27  ;;  %v511_v27 = vld [vmem:[%s4258_s25 + $0x698] sm:$0xff] }
 0x162   : > { %v426_v30 = vld [vmem:[%s4258_s25 + $0x3f0] sm:$0xff]  ;;  %v519_v28 = vld [vmem:[%s4258_s25 + $0x6d8] sm:$0xff] }
 0x163   : > { %v618_v36 = vpack.c.bf16 %v426_v30, %v418_v29  ;;  %v515_v29 = vld [vmem:[%s4258_s25 + $0x6b8] sm:$0xff]  ;;  %v663_v33 = vpack.c.bf16 %v519_v28, %v511_v27 }
 0x164   : > { %v523_v30 = vld [vmem:[%s4258_s25 + $0x6f8] sm:$0xff] }
 0x165   : > { %v667_v34 = vpack.c.bf16 %v523_v30, %v515_v29  ;;  %v2300_v29 = vld [vmem:[#allocation8] sm:$0x3] }
 0x167   : > { %1710 = vmatmul.mubr.bf16.gmra.mrb[8].mxu1 %v574_v39  ;;  %v430_v39 = vld [vmem:[%s4258_s25 + $0x410] sm:$0xff] }
 0x168   : > { %2096 = vmatmul.mubr.bf16.gmra.mrb[8].mxu0 %v578_v40  ;;  %1719 = vmatprep.mubr.bf16.mxu1 %v583_v41  ;;  %v438_v40 = vld [vmem:[%s4258_s25 + $0x450] sm:$0xff] }
 0x169   : > { %2105 = vmatprep.mubr.bf16.mxu0 %v587_v42  ;;  %v434_v41 = vld [vmem:[%s4258_s25 + $0x430] sm:$0xff]  ;;  %v622_v47 = vpack.c.bf16 %v438_v40, %v430_v39  ;;  %v527_v39 = vld [vmem:[%s4258_s25 + $0x718] sm:$0xff] }
 0x16a   : > { %v442_v42 = vld [vmem:[%s4258_s25 + $0x470] sm:$0xff]  ;;  %v535_v40 = vld [vmem:[%s4258_s25 + $0x758] sm:$0xff] }
 0x16b   : > { %v626_v48 = vpack.c.bf16 %v442_v42, %v434_v41  ;;  %v531_v41 = vld [vmem:[%s4258_s25 + $0x738] sm:$0xff]  ;;  %v671_v45 = vpack.c.bf16 %v535_v40, %v527_v39 }
 0x16c   : > { %v539_v42 = vld [vmem:[%s4258_s25 + $0x778] sm:$0xff] }
 0x16d   : > { %v675_v46 = vpack.c.bf16 %v539_v42, %v531_v41 }
 0x16f   : > { %1720 = vmatmul.mubr.bf16.gmra.mrb[12].mxu1 %v582_v51  ;;  %v446_v51 = vld [vmem:[%s4258_s25 + $0x490] sm:$0xff] }
 0x170   : > { %2106 = vmatmul.mubr.bf16.gmra.mrb[12].mxu0 %v586_v52  ;;  %1729 = vmatprep.mubr.bf16.mxu1 %v591_v53  ;;  %v454_v52 = vld [vmem:[%s4258_s25 + $0x4d0] sm:$0xff] }
 0x171   : > { %2115 = vmatprep.mubr.bf16.mxu0 %v595_v54  ;;  %v450_v53 = vld [vmem:[%s4258_s25 + $0x4b0] sm:$0xff]  ;;  %v630_v59 = vpack.c.bf16 %v454_v52, %v446_v51  ;;  %v543_v51 = vld [vmem:[%s4258_s25 + $0x798] sm:$0xff] }
 0x172   : > { %v458_v54 = vld [vmem:[%s4258_s25 + $0x4f0] sm:$0xff]  ;;  %v551_v52 = vld [vmem:[%s4258_s25 + $0x7d8] sm:$0xff] }
 0x173   : > { %v634_v60 = vpack.c.bf16 %v458_v54, %v450_v53  ;;  %v547_v53 = vld [vmem:[%s4258_s25 + $0x7b8] sm:$0xff]  ;;  %v679_v57 = vpack.c.bf16 %v551_v52, %v543_v51 }
 0x174   : > { %v555_v54 = vld [vmem:[%s4258_s25 + $0x7f8] sm:$0xff] }
 0x175   : > { %v683_v58 = vpack.c.bf16 %v555_v54, %v547_v53 }
 0x177   : > { %1730 = vmatmul.mubr.bf16.gmra.mrb[16].mxu1 %v590_v63  ;;  %v462_v63 = vld [vmem:[%s4258_s25 + $0x510] sm:$0xff] }
 0x178   : > { %2116 = vmatmul.mubr.bf16.gmra.mrb[16].mxu0 %v594_v0  ;;  %1739 = vmatprep.mubr.bf16.mxu1 %v599_v1  ;;  %v470_v0 = vld [vmem:[%s4258_s25 + $0x550] sm:$0xff] }
 0x179   : > { %2125 = vmatprep.mubr.bf16.mxu0 %v603_v2  ;;  %v466_v1 = vld [vmem:[%s4258_s25 + $0x530] sm:$0xff]  ;;  %v638_v7 = vpack.c.bf16 %v470_v0, %v462_v63 }
 0x17a   : > { %v474_v2 = vld [vmem:[%s4258_s25 + $0x570] sm:$0xff] }
 0x17b   : > { %v642_v8 = vpack.c.bf16 %v474_v2, %v466_v1  ;;  %v814_v1 = vlaneseq }
 0x17d   : > { %v815_v2 = vshrl.u32 %v814_v1, 7 }
 0x17f   : > { %1740 = vmatmul.mubr.bf16.gmra.mrb[20].mxu1 %v598_v11  ;;  %v478_v11 = vld [vmem:[%s4258_s25 + $0x590] sm:$0xff]  ;;  %v816_v3 = vsub.s32 0, %v815_v2  ;;  %v820_v5 = vsub.s32 1, %v815_v2 }
 0x180   : > { %2126 = vmatmul.mubr.bf16.gmra.mrb[20].mxu0 %v602_v12  ;;  %1749 = vmatprep.mubr.bf16.mxu1 %v607_v13  ;;  %v486_v12 = vld [vmem:[%s4258_s25 + $0x5d0] sm:$0xff] }
 0x181   : > { %2135 = vmatprep.mubr.bf16.mxu0 %v611_v14  ;;  %v482_v13 = vld [vmem:[%s4258_s25 + $0x5b0] sm:$0xff]  ;;  %v646_v19 = vpack.c.bf16 %v486_v12, %v478_v11  ;;  %v4528_v6 = vrot.slane %v812_v4, %v816_v3  ;;  %v4540_v39 = vrot.slane %v2300_v29, %v816_v3  ;;  %v4542_v41 = vrot.slane %v2300_v29, %v820_v5 }
 0x182   : > { %v490_v14 = vld [vmem:[%s4258_s25 + $0x5f0] sm:$0xff] }
 0x183   : > { %v650_v20 = vpack.c.bf16 %v490_v14, %v482_v13 }
 0x187   : > { %1750 = vmatmul.mubr.bf16.gmra.mrb[24].mxu1 %v606_v23  ;;  %v494_v23 = vld [vmem:[%s4258_s25 + $0x610] sm:$0xff] }
 0x188   : > { %2136 = vmatmul.mubr.bf16.gmra.mrb[24].mxu0 %v610_v24  ;;  %1759 = vmatprep.mubr.bf16.mxu1 %v615_v25  ;;  %v502_v24 = vld [vmem:[%s4258_s25 + $0x650] sm:$0xff] }
 0x189   : > { %2145 = vmatprep.mubr.bf16.mxu0 %v619_v26  ;;  %v498_v25 = vld [vmem:[%s4258_s25 + $0x630] sm:$0xff]  ;;  %v654_v31 = vpack.c.bf16 %v502_v24, %v494_v23 }
 0x18a   : > { %v506_v26 = vld [vmem:[%s4258_s25 + $0x670] sm:$0xff] }
 0x18b   : > { %v658_v32 = vpack.c.bf16 %v506_v26, %v498_v25 }
 0x18f   : > { %1760 = vmatmul.mubr.bf16.gmra.mrb[28].mxu1 %v614_v35  ;;  %v510_v35 = vld [vmem:[%s4258_s25 + $0x690] sm:$0xff] }
 0x190   : > { %2146 = vmatmul.mubr.bf16.gmra.mrb[28].mxu0 %v618_v36  ;;  %1769 = vmatprep.mubr.bf16.mxu1 %v623_v37  ;;  %v518_v36 = vld [vmem:[%s4258_s25 + $0x6d0] sm:$0xff] }
 0x191   : > { %2155 = vmatprep.mubr.bf16.mxu0 %v627_v38  ;;  %v514_v37 = vld [vmem:[%s4258_s25 + $0x6b0] sm:$0xff]  ;;  %v662_v43 = vpack.c.bf16 %v518_v36, %v510_v35 }
 0x192   : > { %v522_v38 = vld [vmem:[%s4258_s25 + $0x6f0] sm:$0xff] }
 0x193   : > { %v666_v44 = vpack.c.bf16 %v522_v38, %v514_v37 }
 0x197   : > { %1770 = vmatmul.mubr.bf16.gmra.mrb[32].mxu1 %v622_v47  ;;  %v526_v47 = vld [vmem:[%s4258_s25 + $0x710] sm:$0xff] }
 0x198   : > { %2156 = vmatmul.mubr.bf16.gmra.mrb[32].mxu0 %v626_v48  ;;  %1779 = vmatprep.mubr.bf16.mxu1 %v631_v49  ;;  %v534_v48 = vld [vmem:[%s4258_s25 + $0x750] sm:$0xff] }
 0x199   : > { %2165 = vmatprep.mubr.bf16.mxu0 %v635_v50  ;;  %v530_v49 = vld [vmem:[%s4258_s25 + $0x730] sm:$0xff]  ;;  %v670_v55 = vpack.c.bf16 %v534_v48, %v526_v47 }
 0x19a   : > { %v538_v50 = vld [vmem:[%s4258_s25 + $0x770] sm:$0xff] }
 0x19b   : > { %v674_v56 = vpack.c.bf16 %v538_v50, %v530_v49 }
 0x19f   : > { %1780 = vmatmul.mubr.bf16.gmra.mrb[36].mxu1 %v630_v59  ;;  %v542_v59 = vld [vmem:[%s4258_s25 + $0x790] sm:$0xff] }
 0x1a0   : > { %2166 = vmatmul.mubr.bf16.gmra.mrb[36].mxu0 %v634_v60  ;;  %1789 = vmatprep.mubr.bf16.mxu1 %v639_v61  ;;  %v550_v60 = vld [vmem:[%s4258_s25 + $0x7d0] sm:$0xff] }
 0x1a1   : > { %2175 = vmatprep.mubr.bf16.mxu0 %v643_v62  ;;  %v546_v61 = vld [vmem:[%s4258_s25 + $0x7b0] sm:$0xff]  ;;  %v678_v63 = vpack.c.bf16 %v550_v60, %v542_v59 }
 0x1a2   : > { %v554_v62 = vld [vmem:[%s4258_s25 + $0x7f0] sm:$0xff] }
 0x1a3   : > { %v682_v0 = vpack.c.bf16 %v554_v62, %v546_v61 }
 0x1a7   : > { %1790 = vmatmul.mubr.bf16.gmra.mrb[40].mxu1 %v638_v7  ;;  %v4530_v7 = vrot.slane %v812_v4, %v820_v5 }
 0x1a8   : > { %2176 = vmatmul.mubr.bf16.gmra.mrb[40].mxu0 %v642_v8  ;;  %1799 = vmatprep.mubr.bf16.mxu1 %v647_v9 }
 0x1a9   : > { %2185 = vmatprep.mubr.bf16.mxu0 %v651_v10 }
 0x1af   : > { %1800 = vmatmul.mubr.bf16.gmra.mrb[44].mxu1 %v646_v19 }
 0x1b0   : > { %2186 = vmatmul.mubr.bf16.gmra.mrb[44].mxu0 %v650_v20  ;;  %1809 = vmatprep.mubr.bf16.mxu1 %v655_v21 }
 0x1b1   : > { %2195 = vmatprep.mubr.bf16.mxu0 %v659_v22 }
 0x1b7   : > { %1810 = vmatmul.mubr.bf16.gmra.mrb[48].mxu1 %v654_v31 }
 0x1b8   : > { %2196 = vmatmul.mubr.bf16.gmra.mrb[48].mxu0 %v658_v32  ;;  %1819 = vmatprep.mubr.bf16.mxu1 %v663_v33 }
 0x1b9   : > { %2205 = vmatprep.mubr.bf16.mxu0 %v667_v34 }
 0x1bf   : > { %1820 = vmatmul.mubr.bf16.gmra.mrb[52].mxu1 %v662_v43 }
 0x1c0   : > { %2206 = vmatmul.mubr.bf16.gmra.mrb[52].mxu0 %v666_v44  ;;  %1829 = vmatprep.mubr.bf16.mxu1 %v671_v45 }
 0x1c1   : > { %2215 = vmatprep.mubr.bf16.mxu0 %v675_v46 }
 0x1c7   : > { %1830 = vmatmul.mubr.bf16.gmra.mrb[56].mxu1 %v670_v55 }
 0x1c8   : > { %2216 = vmatmul.mubr.bf16.gmra.mrb[56].mxu0 %v674_v56  ;;  %1839 = vmatprep.mubr.bf16.mxu1 %v679_v57 }
 0x1c9   : > { %2225 = vmatprep.mubr.bf16.mxu0 %v683_v58 }
 0x1cf   : > { %1840 = vmatmul.mubr.bf16.gmra.mrb[60].mxu1 %v678_v63 }
 0x1d0   : > { %2226 = vmatmul.mubr.bf16.gmra.mrb[60].mxu0 %v682_v0 }
 0x22a   : > { %v1691_v8 = vpop.f32.mrb[0].mxu1 }
 0x22b   : > { %v2077_v9 = vpop.f32.mrb[0].mxu0  ;;  %v3096_v10 = vadd.f32 %v1691_v8, %v4528_v6  ;;  %v1693_v11 = vpop.f32.mrb[1].mxu1 }
 0x22c   : > { %v2079_v12 = vpop.f32.mrb[1].mxu0  ;;  %v3098_v13 = vadd.f32 %v1693_v11, %v4530_v7  ;;  %v1695_v14 = vpop.f32.mrb[2].mxu1 }
 0x22d   : > { %v2081_v15 = vpop.f32.mrb[2].mxu0  ;;  %v3097_v16 = vadd.f32 %v3096_v10, %v2077_v9  ;;  %v3100_v17 = vadd.f32 %v1695_v14, %v4528_v6  ;;  %v1697_v18 = vpop.f32.mrb[3].mxu1 }
 0x22e   : > { %v2083_v19 = vpop.f32.mrb[3].mxu0  ;;  %v3099_v20 = vadd.f32 %v3098_v13, %v2079_v12  ;;  %v3102_v21 = vadd.f32 %v1697_v18, %v4530_v7 }
 0x22f   : > { %3676 = vtanh.f32 %v3097_v16  ;;  %v3101_v22 = vadd.f32 %v3100_v17, %v2081_v15 }
 0x230   : > { %3678 = vtanh.f32 %v3099_v20  ;;  %v3103_v23 = vadd.f32 %v3102_v21, %v2083_v19 }
 0x231   : > { %3680 = vtanh.f32 %v3101_v22 }
 0x232   : > { %3682 = vtanh.f32 %v3103_v23  ;;  %v1701_v24 = vpop.f32.mrb[4].mxu1 }
 0x233   : > { %v2087_v25 = vpop.f32.mrb[4].mxu0  ;;  %v3104_v26 = vadd.f32 %v1701_v24, %v4528_v6  ;;  %v1703_v27 = vpop.f32.mrb[5].mxu1 }
 0x234   : > { %v2089_v28 = vpop.f32.mrb[5].mxu0  ;;  %v3106_v30 = vadd.f32 %v1703_v27, %v4530_v7  ;;  %v1705_v31 = vpop.f32.mrb[6].mxu1 }
 0x235   : > { %v2091_v32 = vpop.f32.mrb[6].mxu0  ;;  %v3105_v33 = vadd.f32 %v3104_v26, %v2087_v25  ;;  %v3108_v34 = vadd.f32 %v1705_v31, %v4528_v6  ;;  %v1707_v35 = vpop.f32.mrb[7].mxu1 }
 0x236   : > { %v2093_v36 = vpop.f32.mrb[7].mxu0  ;;  %v3107_v37 = vadd.f32 %v3106_v30, %v2089_v28  ;;  %v3110_v38 = vadd.f32 %v1707_v35, %v4530_v7 }
 0x237   : > { %3684 = vtanh.f32 %v3105_v33  ;;  %v3109_v40 = vadd.f32 %v3108_v34, %v2091_v32 }
 0x238   : > { %3686 = vtanh.f32 %v3107_v37  ;;  %v3111_v42 = vadd.f32 %v3110_v38, %v2093_v36 }
 0x239   : > { %v3677_v43 = vpop.eup %3676  ;;  %3688 = vtanh.f32 %v3109_v40 }
 0x23a   : > { %v3679_v44 = vpop.eup %3678  ;;  %3690 = vtanh.f32 %v3111_v42  ;;  %v1711_v45 = vpop.f32.mrb[8].mxu1  ;;  %v2312_v47 = vmul.f32 %v3677_v43, %v4540_v39 }
 0x23b   : > { %v2097_v46 = vpop.f32.mrb[8].mxu0  ;;  %v3681_v48 = vpop.eup %3680  ;;  %v3112_v49 = vadd.f32 %v1711_v45, %v4528_v6  ;;  %v2313_v52 = vmul.f32 %v3679_v44, %v4542_v41 }
 0x23c   : > { %v1713_v50 = vpop.f32.mrb[9].mxu1  ;;  %v2099_v51 = vpop.f32.mrb[9].mxu0  ;;  %v2314_v57 = vmul.f32 %v3681_v48, %v4540_v39 }
 0x23d   : > { %v3683_v53 = vpop.eup %3682  ;;  %v3114_v54 = vadd.f32 %v1713_v50, %v4530_v7  ;;  %v1715_v55 = vpop.f32.mrb[10].mxu1  ;;  %v3113_v58 = vadd.f32 %v3112_v49, %v2097_v46  ;;  %v2376_v62 = vadd.f32 %v2313_v52, %v2312_v47 }
 0x23e   : > { %v2101_v56 = vpop.f32.mrb[10].mxu0  ;;  %v3116_v59 = vadd.f32 %v1715_v55, %v4528_v6  ;;  %v1717_v60 = vpop.f32.mrb[11].mxu1  ;;  %v2315_v63 = vmul.f32 %v3683_v53, %v4542_v41 }
 0x23f   : > { %v2103_v61 = vpop.f32.mrb[11].mxu0  ;;  %v3115_v0 = vadd.f32 %v3114_v54, %v2099_v51  ;;  %v3118_v1 = vadd.f32 %v1717_v60, %v4530_v7  ;;  %3692 = vtanh.f32 %v3113_v58  ;;  %2377 = vadd.xlane.f32.xlu0 %v2376_v62 }
 0x240   : > { %v3117_v2 = vadd.f32 %v3116_v59, %v2101_v56  ;;  %v2379_v3 = vadd.f32 %v2315_v63, %v2314_v57 }
 0x241   : > { %3694 = vtanh.f32 %v3115_v0  ;;  %v3119_v4 = vadd.f32 %v3118_v1, %v2103_v61  ;;  %v3685_v5 = vpop.eup %3684 }
 0x242   : > { %3696 = vtanh.f32 %v3117_v2  ;;  %v3687_v8 = vpop.eup %3686  ;;  %v1721_v9 = vpop.f32.mrb[12].mxu1  ;;  %v2316_v11 = vmul.f32 %v3685_v5, %v4540_v39 }
 0x243   : > { %3698 = vtanh.f32 %v3119_v4  ;;  %v2107_v10 = vpop.f32.mrb[12].mxu0  ;;  %v3689_v12 = vpop.eup %3688  ;;  %v3120_v13 = vadd.f32 %v1721_v9, %v4528_v6  ;;  %2380 = vadd.xlane.f32.xlu0 %v2379_v3  ;;  %v2317_v16 = vmul.f32 %v3687_v8, %v4542_v41 }
 0x244   : > { %v2109_v14 = vpop.f32.mrb[13].mxu0  ;;  %v1723_v15 = vpop.f32.mrb[13].mxu1  ;;  %v2318_v21 = vmul.f32 %v3689_v12, %v4540_v39 }
 0x245   : > { %v3691_v17 = vpop.eup %3690  ;;  %v3122_v18 = vadd.f32 %v1723_v15, %v4530_v7  ;;  %v1725_v19 = vpop.f32.mrb[14].mxu1  ;;  %v3121_v22 = vadd.f32 %v3120_v13, %v2107_v10  ;;  %v2382_v26 = vadd.f32 %v2317_v16, %v2316_v11 }
 0x246   : > { %v2111_v20 = vpop.f32.mrb[14].mxu0  ;;  %v3124_v23 = vadd.f32 %v1725_v19, %v4528_v6  ;;  %v1727_v24 = vpop.f32.mrb[15].mxu1  ;;  %v2319_v27 = vmul.f32 %v3691_v17, %v4542_v41 }
 0x247   : > { %v2113_v25 = vpop.f32.mrb[15].mxu0  ;;  %v3123_v28 = vadd.f32 %v3122_v18, %v2109_v14  ;;  %v3126_v29 = vadd.f32 %v1727_v24, %v4530_v7  ;;  %3700 = vtanh.f32 %v3121_v22  ;;  %2383 = vadd.xlane.f32.xlu1 %v2382_v26 }
 0x248   : > { %v3125_v30 = vadd.f32 %v3124_v23, %v2111_v20  ;;  %v2385_v31 = vadd.f32 %v2319_v27, %v2318_v21 }
 0x249   : > { %3702 = vtanh.f32 %v3123_v28  ;;  %v3127_v32 = vadd.f32 %v3126_v29, %v2113_v25  ;;  %v3693_v33 = vpop.eup %3692 }
 0x24a   : > { %3704 = vtanh.f32 %v3125_v30  ;;  %v1731_v35 = vpop.f32.mrb[16].mxu1  ;;  %v2320_v37 = vmul.f32 %v3693_v33, %v4540_v39 }
 0x24b   : > { %v3695_v34 = vpop.eup %3694  ;;  %3706 = vtanh.f32 %v3127_v32  ;;  %v2117_v36 = vpop.f32.mrb[16].mxu0  ;;  %v3128_v40 = vadd.f32 %v1731_v35, %v4528_v6  ;;  %2386 = vadd.xlane.f32.xlu1 %v2385_v31 }
 0x24c   : > { %v3697_v38 = vpop.eup %3696  ;;  %v2119_v42 = vpop.f32.mrb[17].mxu0  ;;  %v2321_v44 = vmul.f32 %v3695_v34, %v4542_v41 }
 0x24d   : > { %v1733_v43 = vpop.f32.mrb[17].mxu1  ;;  %v3699_v45 = vpop.eup %3698  ;;  %v2322_v49 = vmul.f32 %v3697_v38, %v4540_v39  ;;  %v3129_v50 = vadd.f32 %v3128_v40, %v2117_v36 }
 0x24e   : > { %v3130_v46 = vadd.f32 %v1733_v43, %v4530_v7  ;;  %v1735_v47 = vpop.f32.mrb[18].mxu1  ;;  %v2121_v48 = vpop.f32.mrb[18].mxu0  ;;  %v2388_v54 = vadd.f32 %v2321_v44, %v2320_v37  ;;  %v2323_v55 = vmul.f32 %v3699_v45, %v4542_v41 }
 0x24f   : > { %v3132_v51 = vadd.f32 %v1735_v47, %v4528_v6  ;;  %v1737_v52 = vpop.f32.mrb[19].mxu1  ;;  %v2123_v53 = vpop.f32.mrb[19].mxu0  ;;  %3708 = vtanh.f32 %v3129_v50 }
 0x250   : > { %v3131_v56 = vadd.f32 %v3130_v46, %v2119_v42  ;;  %v3134_v57 = vadd.f32 %v1737_v52, %v4530_v7  ;;  %2389 = vadd.xlane.f32.xlu0 %v2388_v54  ;;  %v2391_v59 = vadd.f32 %v2323_v55, %v2322_v49 }
 0x251   : > { %v3133_v58 = vadd.f32 %v3132_v51, %v2121_v48  ;;  %v3701_v61 = vpop.eup %3700 }
 0x252   : > { %3710 = vtanh.f32 %v3131_v56  ;;  %v3135_v60 = vadd.f32 %v3134_v57, %v2123_v53  ;;  %2392 = vadd.xlane.f32.xlu1 %v2391_v59  ;;  %v1741_v63 = vpop.f32.mrb[20].mxu1  ;;  %v2324_v1 = vmul.f32 %v3701_v61, %v4540_v39 }
 0x253   : > { %3712 = vtanh.f32 %v3133_v58  ;;  %v3703_v62 = vpop.eup %3702  ;;  %v2127_v0 = vpop.f32.mrb[20].mxu0  ;;  %v3136_v3 = vadd.f32 %v1741_v63, %v4528_v6 }
 0x254   : > { %3714 = vtanh.f32 %v3135_v60  ;;  %v3705_v2 = vpop.eup %3704  ;;  %v1743_v4 = vpop.f32.mrb[21].mxu1  ;;  %v2325_v8 = vmul.f32 %v3703_v62, %v4542_v41 }
 0x255   : > { %v2129_v5 = vpop.f32.mrb[21].mxu0  ;;  %v3707_v9 = vpop.eup %3706  ;;  %v3138_v10 = vadd.f32 %v1743_v4, %v4530_v7  ;;  %v2326_v13 = vmul.f32 %v3705_v2, %v4540_v39  ;;  %v3137_v14 = vadd.f32 %v3136_v3, %v2127_v0 }
 0x256   : > { %v1745_v11 = vpop.f32.mrb[22].mxu1  ;;  %v2131_v12 = vpop.f32.mrb[22].mxu0  ;;  %v2394_v18 = vadd.f32 %v2325_v8, %v2324_v1  ;;  %v2327_v19 = vmul.f32 %v3707_v9, %v4542_v41 }
 0x257   : > { %v3140_v15 = vadd.f32 %v1745_v11, %v4528_v6  ;;  %v1747_v16 = vpop.f32.mrb[23].mxu1  ;;  %v2133_v17 = vpop.f32.mrb[23].mxu0  ;;  %v3139_v20 = vadd.f32 %v3138_v10, %v2129_v5  ;;  %3716 = vtanh.f32 %v3137_v14 }
 0x258   : > { %v3142_v21 = vadd.f32 %v1747_v16, %v4530_v7  ;;  %2395 = vadd.xlane.f32.xlu0 %v2394_v18  ;;  %v2397_v23 = vadd.f32 %v2327_v19, %v2326_v13 }
 0x259   : > { %v3141_v22 = vadd.f32 %v3140_v15, %v2131_v12  ;;  %3718 = vtanh.f32 %v3139_v20  ;;  %v3709_v25 = vpop.eup %3708 }
 0x25a   : > { %v3143_v24 = vadd.f32 %v3142_v21, %v2133_v17  ;;  %2398 = vadd.xlane.f32.xlu1 %v2397_v23  ;;  %v1751_v27 = vpop.f32.mrb[24].mxu1  ;;  %v2328_v29 = vmul.f32 %v3709_v25, %v4540_v39 }
 0x25b   : > { %3720 = vtanh.f32 %v3141_v22  ;;  %v2137_v28 = vpop.f32.mrb[24].mxu0  ;;  %v3144_v31 = vadd.f32 %v1751_v27, %v4528_v6  ;;  %v1753_v32 = vpop.f32.mrb[25].mxu1 }
 0x25c   : > { %v3711_v26 = vpop.eup %3710  ;;  %3722 = vtanh.f32 %v3143_v24  ;;  %v2139_v33 = vpop.f32.mrb[25].mxu0  ;;  %v3146_v36 = vadd.f32 %v1753_v32, %v4530_v7 }
 0x25d   : > { %v3713_v30 = vpop.eup %3712  ;;  %v2329_v34 = vmul.f32 %v3711_v26, %v4542_v41  ;;  %v1755_v37 = vpop.f32.mrb[26].mxu1  ;;  %v3145_v42 = vadd.f32 %v3144_v31, %v2137_v28 }
 0x25e   : > { %v3715_v35 = vpop.eup %3714  ;;  %v2141_v38 = vpop.f32.mrb[26].mxu0  ;;  %v2330_v40 = vmul.f32 %v3713_v30, %v4540_v39  ;;  %v3148_v43 = vadd.f32 %v1755_v37, %v4528_v6  ;;  %v3147_v48 = vadd.f32 %v3146_v36, %v2139_v33 }
 0x25f   : > { %v1757_v44 = vpop.f32.mrb[27].mxu1  ;;  %v2143_v45 = vpop.f32.mrb[27].mxu0  ;;  %v2400_v46 = vadd.f32 %v2329_v34, %v2328_v29  ;;  %v2331_v47 = vmul.f32 %v3715_v35, %v4542_v41  ;;  %3724 = vtanh.f32 %v3145_v42 }
 0x260   : > { %v3150_v49 = vadd.f32 %v1757_v44, %v4530_v7  ;;  %v3149_v50 = vadd.f32 %v3148_v43, %v2141_v38  ;;  %3726 = vtanh.f32 %v3147_v48 }
 0x261   : > { %2401 = vadd.xlane.f32.xlu0 %v2400_v46  ;;  %v2403_v51 = vadd.f32 %v2331_v47, %v2330_v40  ;;  %v3717_v53 = vpop.eup %3716 }
 0x262   : > { %v3151_v52 = vadd.f32 %v3150_v49, %v2143_v45  ;;  %3728 = vtanh.f32 %v3149_v50  ;;  %v1761_v55 = vpop.f32.mrb[28].mxu1  ;;  %v2332_v57 = vmul.f32 %v3717_v53, %v4540_v39 }
 0x263   : > { %2404 = vadd.xlane.f32.xlu1 %v2403_v51  ;;  %v3719_v54 = vpop.eup %3718  ;;  %v2147_v56 = vpop.f32.mrb[28].mxu0  ;;  %v3152_v59 = vadd.f32 %v1761_v55, %v4528_v6 }
 0x264   : > { %3730 = vtanh.f32 %v3151_v52  ;;  %v1763_v60 = vpop.f32.mrb[29].mxu1  ;;  %v2149_v61 = vpop.f32.mrb[29].mxu0  ;;  %v2333_v62 = vmul.f32 %v3719_v54, %v4542_v41 }
 0x265   : > { %v3721_v58 = vpop.eup %3720  ;;  %v3154_v0 = vadd.f32 %v1763_v60, %v4530_v7  ;;  %v1765_v1 = vpop.f32.mrb[30].mxu1  ;;  %v3153_v4 = vadd.f32 %v3152_v59, %v2147_v56 }
 0x266   : > { %v3723_v63 = vpop.eup %3722  ;;  %v2151_v2 = vpop.f32.mrb[30].mxu0  ;;  %v2334_v3 = vmul.f32 %v3721_v58, %v4540_v39  ;;  %v3156_v5 = vadd.f32 %v1765_v1, %v4528_v6  ;;  %v2406_v10 = vadd.f32 %v2333_v62, %v2332_v57 }
 0x267   : > { %v1767_v8 = vpop.f32.mrb[31].mxu1  ;;  %v2153_v9 = vpop.f32.mrb[31].mxu0  ;;  %v2335_v11 = vmul.f32 %v3723_v63, %v4542_v41  ;;  %v3155_v12 = vadd.f32 %v3154_v0, %v2149_v61  ;;  %3732 = vtanh.f32 %v3153_v4 }
 0x268   : > { %v3158_v13 = vadd.f32 %v1767_v8, %v4530_v7  ;;  %v3157_v14 = vadd.f32 %v3156_v5, %v2151_v2  ;;  %2407 = vadd.xlane.f32.xlu0 %v2406_v10 }
 0x269   : > { %v2409_v15 = vadd.f32 %v2335_v11, %v2334_v3  ;;  %3734 = vtanh.f32 %v3155_v12  ;;  %v3725_v17 = vpop.eup %3724 }
 0x26a   : > { %v3159_v16 = vadd.f32 %v3158_v13, %v2153_v9  ;;  %3736 = vtanh.f32 %v3157_v14  ;;  %v3727_v18 = vpop.eup %3726  ;;  %v1771_v19 = vpop.f32.mrb[32].mxu1  ;;  %v2336_v21 = vmul.f32 %v3725_v17, %v4540_v39 }
 0x26b   : > { %2410 = vadd.xlane.f32.xlu1 %v2409_v15  ;;  %v2157_v20 = vpop.f32.mrb[32].mxu0  ;;  %v3160_v23 = vadd.f32 %v1771_v19, %v4528_v6  ;;  %v1773_v24 = vpop.f32.mrb[33].mxu1  ;;  %v2337_v26 = vmul.f32 %v3727_v18, %v4542_v41 }
 0x26c   : > { %3738 = vtanh.f32 %v3159_v16  ;;  %v3729_v22 = vpop.eup %3728  ;;  %v2159_v25 = vpop.f32.mrb[33].mxu0  ;;  %v3162_v28 = vadd.f32 %v1773_v24, %v4530_v7 }
 0x26d   : > { %v1775_v29 = vpop.f32.mrb[34].mxu1  ;;  %v2161_v30 = vpop.f32.mrb[34].mxu0  ;;  %v2338_v31 = vmul.f32 %v3729_v22, %v4540_v39  ;;  %v3161_v32 = vadd.f32 %v3160_v23, %v2157_v20  ;;  %v2412_v36 = vadd.f32 %v2337_v26, %v2336_v21 }
 0x26e   : > { %v3731_v27 = vpop.eup %3730  ;;  %v3164_v33 = vadd.f32 %v1775_v29, %v4528_v6  ;;  %v1777_v34 = vpop.f32.mrb[35].mxu1  ;;  %v3163_v38 = vadd.f32 %v3162_v28, %v2159_v25 }
 0x26f   : > { %v2163_v35 = vpop.f32.mrb[35].mxu0  ;;  %v2339_v37 = vmul.f32 %v3731_v27, %v4542_v41  ;;  %v3166_v40 = vadd.f32 %v1777_v34, %v4530_v7  ;;  %3740 = vtanh.f32 %v3161_v32  ;;  %2413 = vadd.xlane.f32.xlu0 %v2412_v36 }
 0x270   : > { %v3165_v42 = vadd.f32 %v3164_v33, %v2161_v30  ;;  %3742 = vtanh.f32 %v3163_v38 }
 0x271   : > { %v2415_v43 = vadd.f32 %v2339_v37, %v2338_v31  ;;  %v3167_v44 = vadd.f32 %v3166_v40, %v2163_v35  ;;  %v3733_v45 = vpop.eup %3732 }
 0x272   : > { %3744 = vtanh.f32 %v3165_v42  ;;  %v1781_v47 = vpop.f32.mrb[36].mxu1  ;;  %v2340_v49 = vmul.f32 %v3733_v45, %v4540_v39 }
 0x273   : > { %2416 = vadd.xlane.f32.xlu1 %v2415_v43  ;;  %v3735_v46 = vpop.eup %3734  ;;  %3746 = vtanh.f32 %v3167_v44  ;;  %v2167_v48 = vpop.f32.mrb[36].mxu0  ;;  %v3168_v51 = vadd.f32 %v1781_v47, %v4528_v6 }
 0x274   : > { %v3737_v50 = vpop.eup %3736  ;;  %v1783_v52 = vpop.f32.mrb[37].mxu1  ;;  %v2341_v54 = vmul.f32 %v3735_v46, %v4542_v41 }
 0x275   : > { %v2169_v53 = vpop.f32.mrb[37].mxu0  ;;  %v3170_v56 = vadd.f32 %v1783_v52, %v4530_v7  ;;  %v1785_v57 = vpop.f32.mrb[38].mxu1  ;;  %v2342_v59 = vmul.f32 %v3737_v50, %v4540_v39  ;;  %v3169_v60 = vadd.f32 %v3168_v51, %v2167_v48 }
 0x276   : > { %v3739_v55 = vpop.eup %3738  ;;  %v2171_v58 = vpop.f32.mrb[38].mxu0  ;;  %v3172_v61 = vadd.f32 %v1785_v57, %v4528_v6  ;;  %v2418_v0 = vadd.f32 %v2341_v54, %v2340_v49 }
 0x277   : > { %v1787_v62 = vpop.f32.mrb[39].mxu1  ;;  %v2173_v63 = vpop.f32.mrb[39].mxu0  ;;  %v2343_v1 = vmul.f32 %v3739_v55, %v4542_v41  ;;  %v3171_v2 = vadd.f32 %v3170_v56, %v2169_v53  ;;  %3748 = vtanh.f32 %v3169_v60 }
 0x278   : > { %v3174_v3 = vadd.f32 %v1787_v62, %v4530_v7  ;;  %v3173_v4 = vadd.f32 %v3172_v61, %v2171_v58  ;;  %2419 = vadd.xlane.f32.xlu0 %v2418_v0 }
 0x279   : > { %v2421_v5 = vadd.f32 %v2343_v1, %v2342_v59  ;;  %3750 = vtanh.f32 %v3171_v2  ;;  %v3741_v9 = vpop.eup %3740 }
 0x27a   : > { %v3175_v8 = vadd.f32 %v3174_v3, %v2173_v63  ;;  %3752 = vtanh.f32 %v3173_v4  ;;  %v3743_v10 = vpop.eup %3742  ;;  %v1791_v11 = vpop.f32.mrb[40].mxu1  ;;  %v2344_v13 = vmul.f32 %v3741_v9, %v4540_v39 }
 0x27b   : > { %2422 = vadd.xlane.f32.xlu1 %v2421_v5  ;;  %v2177_v12 = vpop.f32.mrb[40].mxu0  ;;  %v3176_v15 = vadd.f32 %v1791_v11, %v4528_v6  ;;  %v1793_v16 = vpop.f32.mrb[41].mxu1  ;;  %v2345_v18 = vmul.f32 %v3743_v10, %v4542_v41 }
 0x27c   : > { %3754 = vtanh.f32 %v3175_v8  ;;  %v3745_v14 = vpop.eup %3744  ;;  %v2179_v17 = vpop.f32.mrb[41].mxu0  ;;  %v3178_v20 = vadd.f32 %v1793_v16, %v4530_v7 }
 0x27d   : > { %v3747_v19 = vpop.eup %3746  ;;  %v1795_v21 = vpop.f32.mrb[42].mxu1  ;;  %v2346_v23 = vmul.f32 %v3745_v14, %v4540_v39  ;;  %v3177_v24 = vadd.f32 %v3176_v15, %v2177_v12  ;;  %v2424_v28 = vadd.f32 %v2345_v18, %v2344_v13 }
 0x27e   : > { %v2181_v22 = vpop.f32.mrb[42].mxu0  ;;  %v3180_v25 = vadd.f32 %v1795_v21, %v4528_v6  ;;  %v1797_v26 = vpop.f32.mrb[43].mxu1  ;;  %v2347_v29 = vmul.f32 %v3747_v19, %v4542_v41  ;;  %v3179_v30 = vadd.f32 %v3178_v20, %v2179_v17 }
 0x27f   : > { %v2183_v27 = vpop.f32.mrb[43].mxu0  ;;  %v3182_v31 = vadd.f32 %v1797_v26, %v4530_v7  ;;  %3756 = vtanh.f32 %v3177_v24  ;;  %2425 = vadd.xlane.f32.xlu0 %v2424_v28 }
 0x280   : > { %v3181_v32 = vadd.f32 %v3180_v25, %v2181_v22  ;;  %v2427_v33 = vadd.f32 %v2347_v29, %v2346_v23  ;;  %3758 = vtanh.f32 %v3179_v30 }
 0x281   : > { %v3183_v34 = vadd.f32 %v3182_v31, %v2183_v27  ;;  %v3749_v35 = vpop.eup %3748 }
 0x282   : > { %3760 = vtanh.f32 %v3181_v32  ;;  %2428 = vadd.xlane.f32.xlu1 %v2427_v33  ;;  %v1801_v37 = vpop.f32.mrb[44].mxu1  ;;  %v2348_v40 = vmul.f32 %v3749_v35, %v4540_v39 }
 0x283   : > { %v3751_v36 = vpop.eup %3750  ;;  %3762 = vtanh.f32 %v3183_v34  ;;  %v2187_v38 = vpop.f32.mrb[44].mxu0  ;;  %v3184_v43 = vadd.f32 %v1801_v37, %v4528_v6 }
 0x284   : > { %v3753_v42 = vpop.eup %3752  ;;  %v1803_v44 = vpop.f32.mrb[45].mxu1  ;;  %v2349_v46 = vmul.f32 %v3751_v36, %v4542_v41 }
 0x285   : > { %v2189_v45 = vpop.f32.mrb[45].mxu0  ;;  %v3186_v48 = vadd.f32 %v1803_v44, %v4530_v7  ;;  %v1805_v49 = vpop.f32.mrb[46].mxu1  ;;  %v2350_v51 = vmul.f32 %v3753_v42, %v4540_v39  ;;  %v3185_v52 = vadd.f32 %v3184_v43, %v2187_v38 }
 0x286   : > { %v3755_v47 = vpop.eup %3754  ;;  %v2191_v50 = vpop.f32.mrb[46].mxu0  ;;  %v3188_v53 = vadd.f32 %v1805_v49, %v4528_v6  ;;  %v2430_v56 = vadd.f32 %v2349_v46, %v2348_v40 }
 0x287   : > { %v1807_v54 = vpop.f32.mrb[47].mxu1  ;;  %v2193_v55 = vpop.f32.mrb[47].mxu0  ;;  %v2351_v57 = vmul.f32 %v3755_v47, %v4542_v41  ;;  %v3187_v58 = vadd.f32 %v3186_v48, %v2189_v45  ;;  %3764 = vtanh.f32 %v3185_v52 }
 0x288   : > { %v3190_v59 = vadd.f32 %v1807_v54, %v4530_v7  ;;  %v3189_v60 = vadd.f32 %v3188_v53, %v2191_v50  ;;  %2431 = vadd.xlane.f32.xlu0 %v2430_v56 }
 0x289   : > { %v2433_v61 = vadd.f32 %v2351_v57, %v2350_v51  ;;  %3766 = vtanh.f32 %v3187_v58  ;;  %v3757_v63 = vpop.eup %3756 }
 0x28a   : > { %v3191_v62 = vadd.f32 %v3190_v59, %v2193_v55  ;;  %3768 = vtanh.f32 %v3189_v60  ;;  %v3759_v0 = vpop.eup %3758  ;;  %v1811_v1 = vpop.f32.mrb[48].mxu1  ;;  %v2352_v3 = vmul.f32 %v3757_v63, %v4540_v39 }
 0x28b   : > { %2434 = vadd.xlane.f32.xlu1 %v2433_v61  ;;  %v2197_v2 = vpop.f32.mrb[48].mxu0  ;;  %v3192_v5 = vadd.f32 %v1811_v1, %v4528_v6  ;;  %v1813_v8 = vpop.f32.mrb[49].mxu1  ;;  %v2353_v10 = vmul.f32 %v3759_v0, %v4542_v41 }
 0x28c   : > { %3770 = vtanh.f32 %v3191_v62  ;;  %v3761_v4 = vpop.eup %3760  ;;  %v2199_v9 = vpop.f32.mrb[49].mxu0  ;;  %v3194_v12 = vadd.f32 %v1813_v8, %v4530_v7 }
 0x28d   : > { %v3763_v11 = vpop.eup %3762  ;;  %v1815_v13 = vpop.f32.mrb[50].mxu1  ;;  %v2354_v15 = vmul.f32 %v3761_v4, %v4540_v39  ;;  %v3193_v16 = vadd.f32 %v3192_v5, %v2197_v2  ;;  %v2436_v20 = vadd.f32 %v2353_v10, %v2352_v3 }
 0x28e   : > { %v2201_v14 = vpop.f32.mrb[50].mxu0  ;;  %v3196_v17 = vadd.f32 %v1815_v13, %v4528_v6  ;;  %v1817_v18 = vpop.f32.mrb[51].mxu1  ;;  %v2355_v21 = vmul.f32 %v3763_v11, %v4542_v41  ;;  %v3195_v22 = vadd.f32 %v3194_v12, %v2199_v9 }
 0x28f   : > { %v2203_v19 = vpop.f32.mrb[51].mxu0  ;;  %v3198_v23 = vadd.f32 %v1817_v18, %v4530_v7  ;;  %3772 = vtanh.f32 %v3193_v16  ;;  %2437 = vadd.xlane.f32.xlu0 %v2436_v20 }
 0x290   : > { %v3197_v24 = vadd.f32 %v3196_v17, %v2201_v14  ;;  %v2439_v25 = vadd.f32 %v2355_v21, %v2354_v15  ;;  %3774 = vtanh.f32 %v3195_v22 }
 0x291   : > { %v3199_v26 = vadd.f32 %v3198_v23, %v2203_v19  ;;  %v3765_v27 = vpop.eup %3764 }
 0x292   : > { %3776 = vtanh.f32 %v3197_v24  ;;  %2440 = vadd.xlane.f32.xlu1 %v2439_v25  ;;  %v1821_v29 = vpop.f32.mrb[52].mxu1  ;;  %v2356_v31 = vmul.f32 %v3765_v27, %v4540_v39 }
 0x293   : > { %v3767_v28 = vpop.eup %3766  ;;  %3778 = vtanh.f32 %v3199_v26  ;;  %v2207_v30 = vpop.f32.mrb[52].mxu0  ;;  %v3200_v33 = vadd.f32 %v1821_v29, %v4528_v6 }
 0x294   : > { %v3769_v32 = vpop.eup %3768  ;;  %v1823_v34 = vpop.f32.mrb[53].mxu1  ;;  %v2357_v36 = vmul.f32 %v3767_v28, %v4542_v41 }
 0x295   : > { %v2209_v35 = vpop.f32.mrb[53].mxu0  ;;  %v3202_v38 = vadd.f32 %v1823_v34, %v4530_v7  ;;  %v1825_v40 = vpop.f32.mrb[54].mxu1  ;;  %v2358_v43 = vmul.f32 %v3769_v32, %v4540_v39  ;;  %v3201_v44 = vadd.f32 %v3200_v33, %v2207_v30 }
 0x296   : > { %v3771_v37 = vpop.eup %3770  ;;  %v2211_v42 = vpop.f32.mrb[54].mxu0  ;;  %v3204_v45 = vadd.f32 %v1825_v40, %v4528_v6  ;;  %v2442_v48 = vadd.f32 %v2357_v36, %v2356_v31 }
 0x297   : > { %v1827_v46 = vpop.f32.mrb[55].mxu1  ;;  %v2213_v47 = vpop.f32.mrb[55].mxu0  ;;  %v2359_v49 = vmul.f32 %v3771_v37, %v4542_v41  ;;  %v3203_v50 = vadd.f32 %v3202_v38, %v2209_v35  ;;  %3780 = vtanh.f32 %v3201_v44 }
 0x298   : > { %v3206_v51 = vadd.f32 %v1827_v46, %v4530_v7  ;;  %v3205_v52 = vadd.f32 %v3204_v45, %v2211_v42  ;;  %2443 = vadd.xlane.f32.xlu0 %v2442_v48 }
 0x299   : > { %v2445_v53 = vadd.f32 %v2359_v49, %v2358_v43  ;;  %3782 = vtanh.f32 %v3203_v50  ;;  %v3773_v55 = vpop.eup %3772 }
 0x29a   : > { %v3207_v54 = vadd.f32 %v3206_v51, %v2213_v47  ;;  %3784 = vtanh.f32 %v3205_v52  ;;  %v3775_v56 = vpop.eup %3774  ;;  %v1831_v57 = vpop.f32.mrb[56].mxu1  ;;  %v2360_v59 = vmul.f32 %v3773_v55, %v4540_v39 }
 0x29b   : > { %2446 = vadd.xlane.f32.xlu1 %v2445_v53  ;;  %v2217_v58 = vpop.f32.mrb[56].mxu0  ;;  %v3208_v61 = vadd.f32 %v1831_v57, %v4528_v6  ;;  %v1833_v62 = vpop.f32.mrb[57].mxu1  ;;  %v2361_v0 = vmul.f32 %v3775_v56, %v4542_v41 }
 0x29c   : > { %3786 = vtanh.f32 %v3207_v54  ;;  %v3777_v60 = vpop.eup %3776  ;;  %v2219_v63 = vpop.f32.mrb[57].mxu0  ;;  %v3210_v2 = vadd.f32 %v1833_v62, %v4530_v7 }
 0x29d   : > { %v3779_v1 = vpop.eup %3778  ;;  %v1835_v3 = vpop.f32.mrb[58].mxu1  ;;  %v2362_v5 = vmul.f32 %v3777_v60, %v4540_v39  ;;  %v3209_v8 = vadd.f32 %v3208_v61, %v2217_v58  ;;  %v2448_v12 = vadd.f32 %v2361_v0, %v2360_v59 }
 0x29e   : > { %v2221_v4 = vpop.f32.mrb[58].mxu0  ;;  %v3212_v9 = vadd.f32 %v1835_v3, %v4528_v6  ;;  %v1837_v10 = vpop.f32.mrb[59].mxu1  ;;  %v2363_v13 = vmul.f32 %v3779_v1, %v4542_v41  ;;  %v3211_v14 = vadd.f32 %v3210_v2, %v2219_v63  ;;  %v4665_v1 = vld [vmem:[#allocation2] ss:$0 sm:$0xff] }
 0x29f   : > { %v2223_v11 = vpop.f32.mrb[59].mxu0  ;;  %v3214_v15 = vadd.f32 %v1837_v10, %v4530_v7  ;;  %3788 = vtanh.f32 %v3209_v8  ;;  %2449 = vadd.xlane.f32.xlu0 %v2448_v12 }
 0x2a0   : > { %v3213_v16 = vadd.f32 %v3212_v9, %v2221_v4  ;;  %v2451_v17 = vadd.f32 %v2363_v13, %v2362_v5  ;;  %3790 = vtanh.f32 %v3211_v14 }
 0x2a1   : > { %v3215_v18 = vadd.f32 %v3214_v15, %v2223_v11  ;;  %v3781_v19 = vpop.eup %3780 }
 0x2a2   : > { %3792 = vtanh.f32 %v3213_v16  ;;  %2452 = vadd.xlane.f32.xlu1 %v2451_v17  ;;  %v1841_v21 = vpop.f32.mrb[60].mxu1  ;;  %v2364_v23 = vmul.f32 %v3781_v19, %v4540_v39 }
 0x2a3   : > { %v3783_v20 = vpop.eup %3782  ;;  %3794 = vtanh.f32 %v3215_v18  ;;  %v2227_v22 = vpop.f32.mrb[60].mxu0  ;;  %v3216_v25 = vadd.f32 %v1841_v21, %v4528_v6 }
 0x2a4   : > { %v3785_v24 = vpop.eup %3784  ;;  %v1843_v26 = vpop.f32.mrb[61].mxu1  ;;  %v2365_v28 = vmul.f32 %v3783_v20, %v4542_v41 }
 0x2a5   : > { %v2229_v27 = vpop.f32.mrb[61].mxu0  ;;  %v3218_v30 = vadd.f32 %v1843_v26, %v4530_v7  ;;  %v1845_v31 = vpop.f32.mrb[62].mxu1  ;;  %v2366_v33 = vmul.f32 %v3785_v24, %v4540_v39  ;;  %v3217_v34 = vadd.f32 %v3216_v25, %v2227_v22 }
 0x2a6   : > { %v3787_v29 = vpop.eup %3786  ;;  %v2231_v32 = vpop.f32.mrb[62].mxu0  ;;  %v3220_v35 = vadd.f32 %v1845_v31, %v4528_v6  ;;  %v2454_v38 = vadd.f32 %v2365_v28, %v2364_v23 }
 0x2a7   : > { %v1847_v36 = vpop.f32.mrb[63].mxu1  ;;  %v2233_v37 = vpop.f32.mrb[63].mxu0  ;;  %v2367_v40 = vmul.f32 %v3787_v29, %v4542_v41  ;;  %v3219_v42 = vadd.f32 %v3218_v30, %v2229_v27  ;;  %3796 = vtanh.f32 %v3217_v34 }
 0x2a8   : > { %v3222_v43 = vadd.f32 %v1847_v36, %v4530_v7  ;;  %v3221_v44 = vadd.f32 %v3220_v35, %v2231_v32  ;;  %2455 = vadd.xlane.f32.xlu0 %v2454_v38 }
 0x2a9   : > { %v2457_v45 = vadd.f32 %v2367_v40, %v2366_v33  ;;  %3798 = vtanh.f32 %v3219_v42  ;;  %v3789_v47 = vpop.eup %3788 }
 0x2aa   : > { %v3223_v46 = vadd.f32 %v3222_v43, %v2233_v37  ;;  %3800 = vtanh.f32 %v3221_v44  ;;  %v3791_v48 = vpop.eup %3790  ;;  %v2368_v6 = vmul.f32 %v3789_v47, %v4540_v39 }
 0x2ab   : > { %2458 = vadd.xlane.f32.xlu1 %v2457_v45  ;;  %v2369_v50 = vmul.f32 %v3791_v48, %v4542_v41 }
 0x2ac   : > { %3802 = vtanh.f32 %v3223_v46  ;;  %v3793_v49 = vpop.eup %3792 }
 0x2ad   : > { %v3795_v51 = vpop.eup %3794  ;;  %v2370_v52 = vmul.f32 %v3793_v49, %v4540_v39  ;;  %v2460_v7 = vadd.f32 %v2369_v50, %v2368_v6 }
 0x2ae   : > { %v2371_v53 = vmul.f32 %v3795_v51, %v4542_v41 }
 0x2af   : > { %2461 = vadd.xlane.f32.xlu0 %v2460_v7 }
 0x2b0   : > { %v2463_v54 = vadd.f32 %v2371_v53, %v2370_v52 }
 0x2b1   : > { %v3797_v55 = vpop.eup %3796 }
 0x2b2   : > { %2464 = vadd.xlane.f32.xlu1 %v2463_v54  ;;  %v2372_v57 = vmul.f32 %v3797_v55, %v4540_v39 }
 0x2b3   : > { %v3799_v56 = vpop.eup %3798 }
 0x2b4   : > { %v3801_v58 = vpop.eup %3800  ;;  %v2373_v59 = vmul.f32 %v3799_v56, %v4542_v41 }
 0x2b5   : > { %v2374_v61 = vmul.f32 %v3801_v58, %v4540_v39 }
 0x2b6   : > { %v3803_v60 = vpop.eup %3802  ;;  %v2466_v62 = vadd.f32 %v2373_v59, %v2372_v57 }
 0x2b7   : > { %v2375_v63 = vmul.f32 %v3803_v60, %v4542_v41 }
 0x2b8   : > { %2467 = vadd.xlane.f32.xlu0 %v2466_v62 }
 0x2b9   : > { %v2469_v0 = vadd.f32 %v2375_v63, %v2374_v61 }
 0x2bb   : > { %2470 = vadd.xlane.f32.xlu1 %v2469_v0 }
 0x2cc   : > { %v2378_v2 = vpop.xlane.xlu0 %2377 }
 0x2cd   : > { %v2479_v3 = vadd.f32 %v4665_v1, %v2378_v2 }
 0x2cf   : > { %2512 = vst.msk [vmem:[%s4668_s6] sm:$0xff] %vm2511_vm0, %v2479_v3 }
 0x2d0   : > { %v2381_v39 = vpop.xlane.xlu0 %2380 }
 0x2d1   : > { %v2480_v41 = vadd.f32 %v4665_v1, %v2381_v39 }
 0x2d3   : > { %2513 = vst.msk [vmem:[%s4668_s6 + $0x8] sm:$0xff] %vm2511_vm0, %v2480_v41 }
 0x2d4   : > { %v2384_v4 = vpop.xlane.xlu1 %2383 }
 0x2d5   : > { %v2481_v5 = vadd.f32 %v4665_v1, %v2384_v4 }
 0x2d7   : > { %2514 = vst.msk [vmem:[%s4668_s6 + $0x10] sm:$0xff] %vm2511_vm0, %v2481_v5 }
 0x2d8   : > { %v2387_v8 = vpop.xlane.xlu1 %2386 }
 0x2d9   : > { %v2482_v9 = vadd.f32 %v4665_v1, %v2387_v8 }
 0x2db   : > { %2515 = vst.msk [vmem:[%s4668_s6 + $0x18] sm:$0xff] %vm2511_vm0, %v2482_v9 }
 0x2dd   : > { %v2390_v10 = vpop.xlane.xlu0 %2389 }
 0x2de   : > { %v2483_v11 = vadd.f32 %v4665_v1, %v2390_v10 }
 0x2df   : > { %v2393_v12 = vpop.xlane.xlu1 %2392 }
 0x2e0   : > { %2516 = vst.msk [vmem:[%s4668_s6 + $0x20] sm:$0xff] %vm2511_vm0, %v2483_v11  ;;  %v2484_v13 = vadd.f32 %v4665_v1, %v2393_v12 }
 0x2e2   : > { %2517 = vst.msk [vmem:[%s4668_s6 + $0x28] sm:$0xff] %vm2511_vm0, %v2484_v13 }
 0x2e5   : > { %v2396_v14 = vpop.xlane.xlu0 %2395 }
 0x2e6   : > { %v2485_v15 = vadd.f32 %v4665_v1, %v2396_v14 }
 0x2e7   : > { %v2399_v16 = vpop.xlane.xlu1 %2398 }
 0x2e8   : > { %2518 = vst.msk [vmem:[%s4668_s6 + $0x30] sm:$0xff] %vm2511_vm0, %v2485_v15  ;;  %v2486_v17 = vadd.f32 %v4665_v1, %v2399_v16 }
 0x2ea   : > { %2519 = vst.msk [vmem:[%s4668_s6 + $0x38] sm:$0xff] %vm2511_vm0, %v2486_v17 }
 0x2ee   : > { %v2402_v18 = vpop.xlane.xlu0 %2401 }
 0x2ef   : > { %v2487_v19 = vadd.f32 %v4665_v1, %v2402_v18 }
 0x2f0   : > { %v2405_v20 = vpop.xlane.xlu1 %2404 }
 0x2f1   : > { %2520 = vst.msk [vmem:[%s4668_s6 + $0x40] sm:$0xff] %vm2511_vm0, %v2487_v19  ;;  %v2488_v21 = vadd.f32 %v4665_v1, %v2405_v20 }
 0x2f3   : > { %2521 = vst.msk [vmem:[%s4668_s6 + $0x48] sm:$0xff] %vm2511_vm0, %v2488_v21 }
 0x2f5   : > { %v2408_v22 = vpop.xlane.xlu0 %2407 }
 0x2f6   : > { %v2489_v23 = vadd.f32 %v4665_v1, %v2408_v22 }
 0x2f8   : > { %v2411_v24 = vpop.xlane.xlu1 %2410  ;;  %2522 = vst.msk [vmem:[%s4668_s6 + $0x50] sm:$0xff] %vm2511_vm0, %v2489_v23 }
 0x2f9   : > { %v2490_v25 = vadd.f32 %v4665_v1, %v2411_v24 }
 0x2fb   : > { %2523 = vst.msk [vmem:[%s4668_s6 + $0x58] sm:$0xff] %vm2511_vm0, %v2490_v25 }
 0x2fc   : > { %v2414_v26 = vpop.xlane.xlu0 %2413 }
 0x2fd   : > { %v2491_v27 = vadd.f32 %v4665_v1, %v2414_v26 }
 0x2ff   : > { %2524 = vst.msk [vmem:[%s4668_s6 + $0x60] sm:$0xff] %vm2511_vm0, %v2491_v27 }
 0x300   : > { %v2417_v28 = vpop.xlane.xlu1 %2416 }
 0x301   : > { %v2492_v29 = vadd.f32 %v4665_v1, %v2417_v28 }
 0x303   : > { %2525 = vst.msk [vmem:[%s4668_s6 + $0x68] sm:$0xff] %vm2511_vm0, %v2492_v29 }
 0x305   : > { %v2420_v30 = vpop.xlane.xlu0 %2419 }
 0x306   : > { %v2493_v31 = vadd.f32 %v4665_v1, %v2420_v30 }
 0x308   : > { %v2423_v32 = vpop.xlane.xlu1 %2422  ;;  %2526 = vst.msk [vmem:[%s4668_s6 + $0x70] sm:$0xff] %vm2511_vm0, %v2493_v31 }
 0x309   : > { %v2494_v33 = vadd.f32 %v4665_v1, %v2423_v32 }
 0x30b   : > { %2527 = vst.msk [vmem:[%s4668_s6 + $0x78] sm:$0xff] %vm2511_vm0, %v2494_v33 }
 0x30c   : > { %v2426_v34 = vpop.xlane.xlu0 %2425 }
 0x30d   : > { %v2495_v35 = vadd.f32 %v4665_v1, %v2426_v34 }
 0x30f   : > { %v2429_v36 = vpop.xlane.xlu1 %2428  ;;  %2528 = vst.msk [vmem:[%s4668_s6 + $0x80] sm:$0xff] %vm2511_vm0, %v2495_v35 }
 0x310   : > { %v2496_v37 = vadd.f32 %v4665_v1, %v2429_v36 }
 0x312   : > { %2529 = vst.msk [vmem:[%s4668_s6 + $0x88] sm:$0xff] %vm2511_vm0, %v2496_v37 }
 0x315   : > { %v2432_v38 = vpop.xlane.xlu0 %2431 }
 0x316   : > { %v2497_v40 = vadd.f32 %v4665_v1, %v2432_v38 }
 0x318   : > { %v2435_v42 = vpop.xlane.xlu1 %2434  ;;  %2530 = vst.msk [vmem:[%s4668_s6 + $0x90] sm:$0xff] %vm2511_vm0, %v2497_v40 }
 0x319   : > { %v2498_v43 = vadd.f32 %v4665_v1, %v2435_v42 }
 0x31b   : > { %2531 = vst.msk [vmem:[%s4668_s6 + $0x98] sm:$0xff] %vm2511_vm0, %v2498_v43 }
 0x31c   : > { %v2438_v44 = vpop.xlane.xlu0 %2437 }
 0x31d   : > { %v2499_v45 = vadd.f32 %v4665_v1, %v2438_v44 }
 0x31f   : > { %v2441_v46 = vpop.xlane.xlu1 %2440  ;;  %2532 = vst.msk [vmem:[%s4668_s6 + $0xa0] sm:$0xff] %vm2511_vm0, %v2499_v45 }
 0x320   : > { %v2500_v47 = vadd.f32 %v4665_v1, %v2441_v46 }
 0x322   : > { %2533 = vst.msk [vmem:[%s4668_s6 + $0xa8] sm:$0xff] %vm2511_vm0, %v2500_v47 }
 0x325   : > { %v2444_v48 = vpop.xlane.xlu0 %2443 }
 0x326   : > { %v2501_v6 = vadd.f32 %v4665_v1, %v2444_v48 }
 0x328   : > { %v2447_v49 = vpop.xlane.xlu1 %2446  ;;  %2534 = vst.msk [vmem:[%s4668_s6 + $0xb0] sm:$0xff] %vm2511_vm0, %v2501_v6 }
 0x329   : > { %v2502_v50 = vadd.f32 %v4665_v1, %v2447_v49 }
 0x32b   : > { %2535 = vst.msk [vmem:[%s4668_s6 + $0xb8] sm:$0xff] %vm2511_vm0, %v2502_v50 }
 0x32c   : > { %v2450_v51 = vpop.xlane.xlu0 %2449 }
 0x32d   : > { %v2503_v52 = vadd.f32 %v4665_v1, %v2450_v51 }
 0x32f   : > { %v2453_v7 = vpop.xlane.xlu1 %2452  ;;  %2536 = vst.msk [vmem:[%s4668_s6 + $0xc0] sm:$0xff] %vm2511_vm0, %v2503_v52 }
 0x330   : > { %v2504_v53 = vadd.f32 %v4665_v1, %v2453_v7 }
 0x332   : > { %2537 = vst.msk [vmem:[%s4668_s6 + $0xc8] sm:$0xff] %vm2511_vm0, %v2504_v53 }
 0x335   : > { %v2456_v54 = vpop.xlane.xlu0 %2455 }
 0x336   : > { %v2505_v55 = vadd.f32 %v4665_v1, %v2456_v54 }
 0x338   : > { %v2459_v56 = vpop.xlane.xlu1 %2458  ;;  %2538 = vst.msk [vmem:[%s4668_s6 + $0xd0] sm:$0xff] %vm2511_vm0, %v2505_v55 }
 0x339   : > { %v2506_v57 = vadd.f32 %v4665_v1, %v2459_v56 }
 0x33b   : > { %2539 = vst.msk [vmem:[%s4668_s6 + $0xd8] sm:$0xff] %vm2511_vm0, %v2506_v57 }
 0x33c   : > { %v2462_v58 = vpop.xlane.xlu0 %2461 }
 0x33d   : > { %v2507_v59 = vadd.f32 %v4665_v1, %v2462_v58 }
 0x33f   : > { %v2465_v60 = vpop.xlane.xlu1 %2464  ;;  %2540 = vst.msk [vmem:[%s4668_s6 + $0xe0] sm:$0xff] %vm2511_vm0, %v2507_v59 }
 0x340   : > { %v2508_v61 = vadd.f32 %v4665_v1, %v2465_v60 }
 0x342   : > { %2541 = vst.msk [vmem:[%s4668_s6 + $0xe8] sm:$0xff] %vm2511_vm0, %v2508_v61 }
 0x345   : > { %v2468_v62 = vpop.xlane.xlu0 %2467  ;;  %2550 = sbr.rel (!%p4929_p8) target bundleno = 900 (0x384), region = 60 }
 0x346   : > { %v2509_v63 = vadd.f32 %v4665_v1, %v2468_v62 }
 0x348   : > { %v2471_v0 = vpop.xlane.xlu1 %2470  ;;  %2542 = vst.msk [vmem:[%s4668_s6 + $0xf0] sm:$0xff] %vm2511_vm0, %v2509_v63 }
 0x349   : > { %v2510_v2 = vadd.f32 %v4665_v1, %v2471_v0 }
 0x34b   : > { %2543 = vst.msk [vmem:[%s4668_s6 + $0xf8] sm:$0xff] %vm2511_vm0, %v2510_v2 }
 0x34c   : > { %s4942_s17 = smov (!%p2553_p5, %s2552_s17), 32 }
 0x34d   : > { %s3075_s26 = sshll.u32 %s4942_s17, 7 }
 0x34e   : > { %p3078_p10 = scmp.eq.s32.totalorder %s3075_s26, 0 }
 0x34f   : > { %s4778_s30 = sshrl.u32 (!%p3078_p10), %s4942_s17, 5 }
 0x350   : > { %2561 = sbr.rel (%p3078_p10) target bundleno = 900 (0x384), region = 64  ;;  %p3079_p3 = scmp.le.s32.totalorder (!%p3078_p10), %s4778_s30, 0 }
 0x357   : > { %2849 = sbr.rel (%p3079_p3) target bundleno = 879 (0x36f), region = 146  ;;  %s4930_s4 = smov (!%p3079_p3), %s4772_s23 }
 0x358   : > { %s4931_s19 = smov (!%p3079_p3), %s4668_s6  ;;  %s4787_s8 = smov (!%p3079_p3), 0  }
 0x359   : > { %s4789_s7 = smov (!%p3079_p3), 0  }
 0x35e LB: >> { %v2685_v1 = vld [vmem:[%s3998_s19] sm:$0xff]  ;;  %v2687_v3 = vld [vmem:[%s3998_s19 + $0x8] sm:$0xff]  ;;  %v2689_v39 = vld [vmem:[%s3998_s19 + $0x10] sm:$0xff]  ;;  %s2749_s10 = sadd.s32 1, %s4002_s8  ;;  %s2679_s7 = sadd.s32 1, %s4006_s7   ;;  %s4006_s7 = sphi %s4789_s7, %s2679_s7   ;;  %s4002_s8 = sphi %s4787_s8, %s4934_s8   ;;  %s3998_s19 = sphi %s4931_s19, %s4933_s19   ;;  %s3994_s4 = sphi %s4930_s4, %s4932_s4  }
 0x35f   : >> { %2686 = vst [vmem:[%s3994_s4] sm:$0xff] %v2685_v1  ;;  %2688 = vst [vmem:[%s3994_s4 + $0x8] sm:$0xff] %v2687_v3  ;;  %v2691_v41 = vld [vmem:[%s3998_s19 + $0x18] sm:$0xff]  ;;  %v2693_v4 = vld [vmem:[%s3998_s19 + $0x20] sm:$0xff]  ;;  %p2750_p11 = scmp.ge.s32.totalorder %s2749_s10, %s4778_s30  ;;  %p2678_p13 = scmp.ge.s32.totalorder %s2679_s7, %s4778_s30 }
 0x360   : >> { %2690 = vst [vmem:[%s3994_s4 + $0x10] sm:$0xff] %v2689_v39  ;;  %v2695_v5 = vld [vmem:[%s3998_s19 + $0x28] sm:$0xff]  ;;  %2692 = vst [vmem:[%s3994_s4 + $0x18] sm:$0xff] %v2691_v41  ;;  %v2697_v8 = vld [vmem:[%s3998_s19 + $0x30] sm:$0xff] }
 0x361   : >> { %2694 = vst [vmem:[%s3994_s4 + $0x20] sm:$0xff] %v2693_v4  ;;  %2696 = vst [vmem:[%s3994_s4 + $0x28] sm:$0xff] %v2695_v5  ;;  %v2699_v9 = vld [vmem:[%s3998_s19 + $0x38] sm:$0xff]  ;;  %v2701_v10 = vld [vmem:[%s3998_s19 + $0x40] sm:$0xff]  ;;  %s4944_s10 = smov (%p2750_p11, %s2749_s10), 0 }
 0x362   : >> { %2698 = vst [vmem:[%s3994_s4 + $0x30] sm:$0xff] %v2697_v8  ;;  %2700 = vst [vmem:[%s3994_s4 + $0x38] sm:$0xff] %v2699_v9  ;;  %v2703_v11 = vld [vmem:[%s3998_s19 + $0x48] sm:$0xff]  ;;  %v2705_v12 = vld [vmem:[%s3998_s19 + $0x50] sm:$0xff]  ;;  %s3080_s9 = sshll.u32 %s4944_s10, 8  ;;  %s4934_s8 = smov %s4944_s10 }
 0x363   : >> { %2702 = vst [vmem:[%s3994_s4 + $0x40] sm:$0xff] %v2701_v10  ;;  %v2707_v13 = vld [vmem:[%s3998_s19 + $0x58] sm:$0xff]  ;;  %2704 = vst [vmem:[%s3994_s4 + $0x48] sm:$0xff] %v2703_v11  ;;  %v2709_v14 = vld [vmem:[%s3998_s19 + $0x60] sm:$0xff]  ;;  %s4845_s13 = scalar_lea.vmem %s4668_s6, %s3080_s9 [#allocation10]   ;;  %s2755_s28 = scalar_lea.vmem %s4772_s23, %s3080_s9  }
 0x364   : >> { %2706 = vst [vmem:[%s3994_s4 + $0x50] sm:$0xff] %v2705_v12  ;;  %2708 = vst [vmem:[%s3994_s4 + $0x58] sm:$0xff] %v2707_v13  ;;  %v2711_v15 = vld [vmem:[%s3998_s19 + $0x68] sm:$0xff]  ;;  %v2713_v16 = vld [vmem:[%s3998_s19 + $0x70] sm:$0xff] }
 0x365   : >> { %2710 = vst [vmem:[%s3994_s4 + $0x60] sm:$0xff] %v2709_v14  ;;  %2712 = vst [vmem:[%s3994_s4 + $0x68] sm:$0xff] %v2711_v15  ;;  %v2715_v17 = vld [vmem:[%s3998_s19 + $0x78] sm:$0xff]  ;;  %v2717_v18 = vld [vmem:[%s3998_s19 + $0x80] sm:$0xff] }
 0x366   : >> { %2714 = vst [vmem:[%s3994_s4 + $0x70] sm:$0xff] %v2713_v16  ;;  %v2719_v19 = vld [vmem:[%s3998_s19 + $0x88] sm:$0xff]  ;;  %2716 = vst [vmem:[%s3994_s4 + $0x78] sm:$0xff] %v2715_v17  ;;  %v2721_v20 = vld [vmem:[%s3998_s19 + $0x90] sm:$0xff] }
 0x367   : >> { %2718 = vst [vmem:[%s3994_s4 + $0x80] sm:$0xff] %v2717_v18  ;;  %2720 = vst [vmem:[%s3994_s4 + $0x88] sm:$0xff] %v2719_v19  ;;  %v2723_v21 = vld [vmem:[%s3998_s19 + $0x98] sm:$0xff]  ;;  %v2725_v22 = vld [vmem:[%s3998_s19 + $0xa0] sm:$0xff] }
 0x368   : >> { %2722 = vst [vmem:[%s3994_s4 + $0x90] sm:$0xff] %v2721_v20  ;;  %2724 = vst [vmem:[%s3994_s4 + $0x98] sm:$0xff] %v2723_v21  ;;  %v2727_v23 = vld [vmem:[%s3998_s19 + $0xa8] sm:$0xff]  ;;  %v2729_v24 = vld [vmem:[%s3998_s19 + $0xb0] sm:$0xff]  ;;  %2681 = sbr.rel (!%p2678_p13) target bundleno = 862 (0x35e), region = 152 }
 0x369   : >> { %2726 = vst [vmem:[%s3994_s4 + $0xa0] sm:$0xff] %v2725_v22  ;;  %v2731_v25 = vld [vmem:[%s3998_s19 + $0xb8] sm:$0xff]  ;;  %2728 = vst [vmem:[%s3994_s4 + $0xa8] sm:$0xff] %v2727_v23  ;;  %v2733_v26 = vld [vmem:[%s3998_s19 + $0xc0] sm:$0xff] }
 0x36a   : >> { %2730 = vst [vmem:[%s3994_s4 + $0xb0] sm:$0xff] %v2729_v24  ;;  %2732 = vst [vmem:[%s3994_s4 + $0xb8] sm:$0xff] %v2731_v25  ;;  %v2735_v27 = vld [vmem:[%s3998_s19 + $0xc8] sm:$0xff]  ;;  %v2737_v28 = vld [vmem:[%s3998_s19 + $0xd0] sm:$0xff] }
 0x36b   : >> { %2734 = vst [vmem:[%s3994_s4 + $0xc0] sm:$0xff] %v2733_v26  ;;  %2736 = vst [vmem:[%s3994_s4 + $0xc8] sm:$0xff] %v2735_v27  ;;  %v2739_v29 = vld [vmem:[%s3998_s19 + $0xd8] sm:$0xff]  ;;  %v2741_v30 = vld [vmem:[%s3998_s19 + $0xe0] sm:$0xff] }
 0x36c   : >> { %2738 = vst [vmem:[%s3994_s4 + $0xd0] sm:$0xff] %v2737_v28  ;;  %v2743_v31 = vld [vmem:[%s3998_s19 + $0xe8] sm:$0xff]  ;;  %2740 = vst [vmem:[%s3994_s4 + $0xd8] sm:$0xff] %v2739_v29  ;;  %v2745_v32 = vld [vmem:[%s3998_s19 + $0xf0] sm:$0xff] }
 0x36d   : >> { %2742 = vst [vmem:[%s3994_s4 + $0xe0] sm:$0xff] %v2741_v30  ;;  %2744 = vst [vmem:[%s3994_s4 + $0xe8] sm:$0xff] %v2743_v31  ;;  %v2747_v33 = vld [vmem:[%s3998_s19 + $0xf8] sm:$0xff]  ;;  %s4933_s19 = smov %s4845_s13 }
 0x36e   : >> { %2746 = vst [vmem:[%s3994_s4 + $0xf0] sm:$0xff] %v2745_v32  ;;  %2748 = vst [vmem:[%s3994_s4 + $0xf8] sm:$0xff] %v2747_v33  ;;  %s4932_s4 = smov %s2755_s28 }
 0x36f PF: > { %s4886_s15 = sand.u32 31, %s4942_s17   ;;  %s3094_s16 = sshll.u32 %s4778_s30, 8 }
 0x370   : > { %s2760_s20 = scalar_lea.vmem %s4668_s6, %s3094_s16 [#allocation10]   ;;  %s2762_s25 = scalar_lea.vmem %s4772_s23, %s3094_s16  }
 0x371   : > { %p3085_p1 = scmp.le.s32.totalorder %s4886_s15, 0 }
 0x372   : > { %s4008_s29 = smov (!%p3085_p1), %s2762_s25   ;;  %s4012_s12 = smov (!%p3085_p1), %s2760_s20  }
 0x373   : > { %2863 = sbr.rel (%p3085_p1) target bundleno = 900 (0x384), region = 157  ;;  %s4016_s14 = smov (!%p3085_p1), 0  }
 0x374   : > { %s4020_s18 = smov (!%p3085_p1), 0  }
 0x37a LB: >> { %v2772_v34 = vld [vmem:[%s4014_s12] sm:$0xff]  ;;  %s2774_s17 = sadd.s32 1, %s4018_s14  ;;  %s2766_s18 = sadd.s32 1, %s4022_s18   ;;  %s4022_s18 = sphi %s4020_s18, %s2766_s18   ;;  %s4018_s14 = sphi %s4016_s14, %s4017_s14   ;;  %s4014_s12 = sphi %s4012_s12, %s2779_s12   ;;  %s4010_s29 = sphi %s4008_s29, %s2780_s29  }
 0x37b   : >> { %2773 = vst [vmem:[%s4010_s29] sm:$0xff] %v2772_v34  ;;  %p2775_p7 = scmp.ge.s32.totalorder %s2774_s17, %s4886_s15  ;;  %p2765_p6 = scmp.ge.s32.totalorder %s2766_s18, %s4886_s15 }
 0x37d   : >> { %s4946_s17 = smov (%p2775_p7, %s2774_s17), 0  ;;  %2768 = sbr.rel (!%p2765_p6) target bundleno = 890 (0x37a), region = 163 }
 0x37e   : >> { %s3086_s6 = sshll.u32 %s4946_s17, 3  ;;  %s4017_s14 = smov %s4946_s17  }
 0x37f   : >> { %s2779_s12 = scalar_lea.vmem %s2760_s20, %s3086_s6 [#allocation10]   ;;  %s2780_s29 = scalar_lea.vmem %s2762_s25, %s3086_s6  }
 0x384 PF: > { %p19_p9 = scmp.ge.s32.totalorder %s4087_s24, 4   ;;  %s4935_s20 = smov %s3982_s21 }
 0x385   : > { %s4936_s21 = smov %s3986_s22  ;;  %s4937_s22 = smov %s4097_s27 }
 0x386   : > { %s4938_s23 = smov %s4087_s24  ;;  %21 = sbr.rel (!%p19_p9) target bundleno = 8 (0x8), region = 174 }
 0x38d   :  { %2796 = vsyncpa [#allocation4], 1 }
 0x38e   :  { %2798 = vsyncpa [#allocation4 + $0x1], 1 }
 0x38f   :  { %2799 = vsyncpa [#allocation6], 1 }
 0x390   :  { %2800 = vsyncpa [#allocation9], 1 }

</bundles_post_ra>
